<compile_context>
chip_gen: v5e
topology: v5e:2x2
jax: 0.10.0
libtpu: 0.0.40
codegen_flags: <defaults>
</compile_context>

<pallas_src>
import functools

import jax
import jax.numpy as jnp
import numpy as np
from jax.experimental import pallas as pl
from jax.experimental.pallas import tpu as pltpu


def _autoint_kernel(x_ref, mask_ref, fsel_ref, bsel_ref,
                    wfa_ref, bfa_ref, win_ref, bin_ref, wpo_ref, bpo_ref,
                    w3_ref, bo_ref, pred_ref,
                    *, Bt, F, D, H, L, compute_dtype):
    f32 = jnp.float32
    cdt = compute_dtype
    BtF = Bt * F
    hd = D // H
    scale = 1.0 / float(np.sqrt(hd))

    x = x_ref[...]                                                     # [BtF, E]

    # fused atten_embedding / res_embedding: one MXU pass over x
    ar = jnp.dot(x, wfa_ref[...], preferred_element_type=f32) + bfa_ref[...]   # [BtF, 2D]
    h = ar[:, :D]                                                      # atten embedding
    vres = ar[:, D:2 * D]                                              # residual embedding

    # block-diagonal additive mask (0 within a sample, -1e30 across samples)
    mask_add = mask_ref[...]                                           # [BtF, BtF]

    # stacked nn.MultiheadAttention layers (dropout=0, eval semantics)
    for l in range(L):
        qkv = (jnp.dot(h.astype(cdt), win_ref[l], preferred_element_type=f32)
               + bin_ref[l])                                           # [BtF, 3D]
        heads = []
        for hh in range(H):                                            # H is a small static hparam
            qh = qkv[:, hh * hd:(hh + 1) * hd]
            kh = qkv[:, D + hh * hd:D + (hh + 1) * hd]
            vh = qkv[:, 2 * D + hh * hd:2 * D + (hh + 1) * hd]
            s = jax.lax.dot_general(qh.astype(cdt), kh.astype(cdt),
                                    (((1,), (1,)), ((), ())),
                                    preferred_element_type=f32)        # [BtF, BtF]
            s = s * scale + mask_add
            s = s - jnp.max(s, axis=-1, keepdims=True)
            p = jnp.exp(s)
            p = p * pl.reciprocal(jnp.sum(p, axis=-1, keepdims=True), approx=True)
            heads.append(jnp.dot(p.astype(cdt), vh.astype(cdt),
                                 preferred_element_type=f32))          # [BtF, hd]
        ctx = jnp.concatenate(heads, axis=-1)                          # [BtF, D]
        h = (jnp.dot(ctx.astype(cdt), wpo_ref[l], preferred_element_type=f32)
             + bpo_ref[l])

    # residual + relu
    h = jnp.maximum(h + vres, 0.0)                                     # [BtF, D]

    # final Linear(F*D -> O): F accumulated full-width matmuls (rows of other fields
    # zeroed via the one-hot fsel), then per-sample field sum via a 0/1 selection matmul.
    O_pad = pred_ref.shape[-1]
    contrib = jnp.zeros((BtF, O_pad), f32)
    for f in range(F):
        hf = h * fsel_ref[:, f:f + 1]                                  # zero rows of other fields
        contrib = contrib + jnp.dot(hf.astype(cdt), w3_ref[f],
                                    preferred_element_type=f32)        # [BtF, O_pad]
    pred = jnp.dot(bsel_ref[...], contrib, preferred_element_type=f32) + bo_ref[...]
    pred_ref[...] = pred                                               # single lane-dense store


def autoint_forward(cat, num, params, *, num_heads, num_layers,
                    batch_tile=32, compute_dtype=jnp.float32):
    B, n_cat = cat.shape
    num_num = num.shape[1]
    E = params["num_emb"].shape[1]
    D = params["atten_w"].shape[0]
    out_dim = params["out_b"].shape[0]
    F = n_cat + num_num
    L = num_layers
    cdt = compute_dtype

    # ---- glue: categorical embedding lookups + numerical embedding scaling ----
    cat_embed = jnp.stack(
        [params["cat_tables"][i][cat[:, i]] for i in range(n_cat)], axis=1)   # [B, n_cat, E]
    num_embed = num[:, :, None] * params["num_emb"][None, :, :]              # [B, num_num, E]
    x = jnp.concatenate([num_embed, cat_embed], axis=1).astype(jnp.float32)  # [B, F, E]

    # ---- batch tiling (16-aligned tiles when the batch must be split/padded) ----
    if B <= batch_tile:
        Bt = B
    else:
        Bt = max(16, (batch_tile // 16) * 16)
    Bpad = ((B + Bt - 1) // Bt) * Bt
    BtF = Bt * F

    x_flat = x.reshape(B * F, E)
    if Bpad != B:
        x_flat = jnp.pad(x_flat, ((0, (Bpad - B) * F), (0, 0)))
    x_flat = x_flat.astype(cdt)

    O_pad = ((out_dim + 127) // 128) * 128                             # lane-dense output slab

    # ---- constant masks (host-built, resident in VMEM) ----
    r = np.arange(BtF)
    mask_add = np.where((r[:, None] // F) == (r[None, :] // F), 0.0, -1e30).astype(np.float32)
    fsel = (np.arange(F)[None, :] == (r[:, None] % F)).astype(np.float32)      # [BtF, F]
    bsel = ((r[None, :] // F) == np.arange(Bt)[:, None]).astype(np.float32)    # [Bt, BtF]
    mask_add, fsel, bsel = jnp.asarray(mask_add), jnp.asarray(fsel), jnp.asarray(bsel)

    # ---- weight prep: pre-transposed so the kernel computes x @ W + b ----
    wfa = jnp.concatenate([params["atten_w"].T, params["res_w"].T], axis=1).astype(cdt)   # [E, 2D]
    bfa = jnp.concatenate([params["atten_b"], params["res_b"]]).reshape(1, 2 * D).astype(jnp.float32)
    win = jnp.transpose(params["in_proj_w"], (0, 2, 1)).astype(cdt)           # [L, D, 3D]
    binb = params["in_proj_b"].reshape(L, 1, 3 * D).astype(jnp.float32)       # [L, 1, 3D]
    wpo = jnp.transpose(params["out_proj_w"], (0, 2, 1)).astype(cdt)          # [L, D, D]
    bpob = params["out_proj_b"].reshape(L, 1, D).astype(jnp.float32)          # [L, 1, D]
    w3 = params["out_w"].T.reshape(F, D, out_dim)
    w3 = jnp.pad(w3, ((0, 0), (0, 0), (0, O_pad - out_dim))).astype(cdt)      # [F, D, O_pad]
    bo = jnp.pad(params["out_b"], (0, O_pad - out_dim)).reshape(1, O_pad).astype(jnp.float32)

    args = (x_flat, mask_add, fsel, bsel, wfa, bfa, win, binb, wpo, bpob, w3, bo)

    def resident(a):   # same block every grid step -> fetched once, stays in VMEM
        return pl.BlockSpec(a.shape, lambda i, _nd=a.ndim: (0,) * _nd)

    in_specs = ([pl.BlockSpec((BtF, E), lambda i: (i, 0))]
                + [resident(a) for a in args[1:]])
    out_specs = pl.BlockSpec((Bt, O_pad), lambda i: (i, 0))

    kernel = functools.partial(_autoint_kernel, Bt=Bt, F=F, D=D,
                               H=num_heads, L=L, compute_dtype=cdt)
    pred = pl.pallas_call(
        kernel,
        out_shape=jax.ShapeDtypeStruct((Bpad, O_pad), jnp.float32),
        grid=(Bpad // Bt,),
        in_specs=in_specs,
        out_specs=out_specs,
        compiler_params=pltpu.CompilerParams(dimension_semantics=("parallel",)),
    )(*args)
    return pred[:B, :out_dim]


def autoint_reference(cat, num, params, *, num_heads, num_layers):
    """Pure-JAX reference mirroring the PyTorch forward (predict=False)."""
    B, n_cat = cat.shape
    D = params["atten_w"].shape[0]
    F = n_cat + num.shape[1]
    H = num_heads
    hd = D // H

    cat_embed = jnp.stack(
        [params["cat_tables"][i][cat[:, i]] for i in range(n_cat)], axis=1)
    num_embed = num[:, :, None] * params["num_emb"][None, :, :]
    x = jnp.concatenate([num_embed, cat_embed], axis=1)                 # [B, F, E]

    atten = jnp.einsum('bfe,de->bfd', x, params["atten_w"]) + params["atten_b"]
    vres = jnp.einsum('bfe,de->bfd', x, params["res_w"]) + params["res_b"]
    h = atten
    scale = 1.0 / np.sqrt(hd)
    for l in range(num_layers):
        qkv = jnp.einsum('bfd,od->bfo', h, params["in_proj_w"][l]) + params["in_proj_b"][l]
        q, k, v = qkv[..., :D], qkv[..., D:2 * D], qkv[..., 2 * D:]
        sh = lambda t: t.reshape(B, F, H, hd).transpose(0, 2, 1, 3)
        qh, kh, vh = sh(q) * scale, sh(k), sh(v)
        s = jnp.einsum('bhqe,bhke->bhqk', qh, kh)
        p = jax.nn.softmax(s, axis=-1)
        o = jnp.einsum('bhqk,bhke->bhqe', p, vh).transpose(0, 2, 1, 3).reshape(B, F, D)
        h = jnp.einsum('bfd,od->bfo', o, params["out_proj_w"][l]) + params["out_proj_b"][l]
    h = jax.nn.relu(h + vres)
    return h.reshape(B, F * D) @ params["out_w"].T + params["out_b"]


def init_params(key, num_num, cat_dims, E, D, L, out_dim):
    F = num_num + len(cat_dims)
    keys = jax.random.split(key, 12)
    p = {}
    p["cat_tables"] = [
        0.1 * jax.random.normal(jax.random.fold_in(keys[0], i), (c, E), jnp.float32)
        for i, c in enumerate(cat_dims)]
    p["num_emb"] = 0.01 * jax.random.normal(keys[1], (num_num, E), jnp.float32)
    p["atten_w"] = 0.1 * jax.random.normal(keys[2], (D, E), jnp.float32)
    p["atten_b"] = 0.1 * jax.random.normal(keys[3], (D,), jnp.float32)
    p["res_w"] = 0.1 * jax.random.normal(keys[4], (D, E), jnp.float32)
    p["res_b"] = 0.1 * jax.random.normal(keys[5], (D,), jnp.float32)
    p["in_proj_w"] = 0.1 * jax.random.normal(keys[6], (L, 3 * D, D), jnp.float32)
    p["in_proj_b"] = 0.1 * jax.random.normal(keys[7], (L, 3 * D), jnp.float32)
    p["out_proj_w"] = 0.1 * jax.random.normal(keys[8], (L, D, D), jnp.float32)
    p["out_proj_b"] = 0.1 * jax.random.normal(keys[9], (L, D), jnp.float32)
    p["out_w"] = 0.1 * jax.random.normal(keys[10], (out_dim, F * D), jnp.float32)
    p["out_b"] = 0.1 * jax.random.normal(keys[11], (out_dim,), jnp.float32)
    return p


if __name__ == "__main__":
    # AutoInt(num_num=2, cat_dims=[5,7,9,11], embed_size=8, atten_embed_dim=16,
    #         output_size=1, num_heads=2, num_layers=2, dropout=0,
    #         has_residual=True, predict=False)
    B = 4
    num_num = 2
    cat_dims = [5, 7, 9, 11]
    E = 8
    D = 16
    H = 2
    L = 2
    out_dim = 1

    key = jax.random.PRNGKey(0)
    k_cat, k_num, k_param = jax.random.split(key, 3)
    cat = jnp.stack(
        [jax.random.randint(jax.random.fold_in(k_cat, i), (B,), 0, c)
         for i, c in enumerate(cat_dims)], axis=1)                       # [B, 4] int32
    num = jax.random.normal(k_num, (B, num_num), jnp.float32)            # [B, 2]
    params = init_params(k_param, num_num, cat_dims, E, D, L, out_dim)

    ref = autoint_reference(cat, num, params, num_heads=H, num_layers=L)

    # f32 path (tight check; approx reciprocal in softmax -> 5e-3 tolerance)
    pred = autoint_forward(cat, num, params, num_heads=H, num_layers=L)
    pred = jax.block_until_ready(pred)
    np.testing.assert_allclose(np.asarray(pred), np.asarray(ref), rtol=5e-3, atol=5e-3)

    # bf16 MXU path (v6e/v7x recommendation); loose check
    pred_bf16 = autoint_forward(cat, num, params, num_heads=H, num_layers=L,
                                compute_dtype=jnp.bfloat16)
    pred_bf16 = jax.block_until_ready(pred_bf16)
    assert bool(jnp.all(jnp.isfinite(pred_bf16)))
    np.testing.assert_allclose(np.asarray(pred_bf16), np.asarray(ref), rtol=0.1, atol=0.1)

    print("KERNEL_OK")
</pallas_src>

<mosaic_0001>
module attributes {stable_mosaic.version = 11 : i64} {
  func.func @_autoint_kernel(%arg0: i32, %arg1: memref<24x8xf32, #tpu.memory_space<vmem>>, %arg2: memref<24x24xf32, #tpu.memory_space<vmem>>, %arg3: memref<24x6xf32, #tpu.memory_space<vmem>>, %arg4: memref<4x24xf32, #tpu.memory_space<vmem>>, %arg5: memref<8x32xf32, #tpu.memory_space<vmem>>, %arg6: memref<1x32xf32, #tpu.memory_space<vmem>>, %arg7: memref<2x16x48xf32, #tpu.memory_space<vmem>>, %arg8: memref<2x1x48xf32, #tpu.memory_space<vmem>>, %arg9: memref<2x16x16xf32, #tpu.memory_space<vmem>>, %arg10: memref<2x1x16xf32, #tpu.memory_space<vmem>>, %arg11: memref<6x16x128xf32, #tpu.memory_space<vmem>>, %arg12: memref<1x128xf32, #tpu.memory_space<vmem>>, %arg13: memref<4x128xf32, #tpu.memory_space<vmem>>) attributes {dimension_semantics = [#tpu.dimension_semantics<parallel>], iteration_bounds = array<i64: 1>, scalar_prefetch = 0 : i64, scratch_operands = 0 : i64, tpu.core_type = #tpu.core_type<tc>, window_params = [{transform_indices = @transform_0, window_bounds = array<i64: 24, 8>}, {pipeline_mode = #tpu.pipeline_mode<synchronous>, transform_indices = @transform_1, window_bounds = array<i64: 24, 24>}, {pipeline_mode = #tpu.pipeline_mode<synchronous>, transform_indices = @transform_2, window_bounds = array<i64: 24, 6>}, {pipeline_mode = #tpu.pipeline_mode<synchronous>, transform_indices = @transform_3, window_bounds = array<i64: 4, 24>}, {pipeline_mode = #tpu.pipeline_mode<synchronous>, transform_indices = @transform_4, window_bounds = array<i64: 8, 32>}, {pipeline_mode = #tpu.pipeline_mode<synchronous>, transform_indices = @transform_5, window_bounds = array<i64: 1, 32>}, {pipeline_mode = #tpu.pipeline_mode<synchronous>, transform_indices = @transform_6, window_bounds = array<i64: 2, 16, 48>}, {pipeline_mode = #tpu.pipeline_mode<synchronous>, transform_indices = @transform_7, window_bounds = array<i64: 2, 1, 48>}, {pipeline_mode = #tpu.pipeline_mode<synchronous>, transform_indices = @transform_8, window_bounds = array<i64: 2, 16, 16>}, {pipeline_mode = #tpu.pipeline_mode<synchronous>, transform_indices = @transform_9, window_bounds = array<i64: 2, 1, 16>}, {pipeline_mode = #tpu.pipeline_mode<synchronous>, transform_indices = @transform_10, window_bounds = array<i64: 6, 16, 128>}, {pipeline_mode = #tpu.pipeline_mode<synchronous>, transform_indices = @transform_11, window_bounds = array<i64: 1, 128>}, {transform_indices = @transform_12, window_bounds = array<i64: 4, 128>}]} {
    %c0 = arith.constant 0 : index
    %c0_0 = arith.constant 0 : index
    %0 = vector.load %arg1[%c0, %c0_0] : memref<24x8xf32, #tpu.memory_space<vmem>>, vector<24x8xf32>
    %c0_1 = arith.constant 0 : index
    %c0_2 = arith.constant 0 : index
    %1 = vector.load %arg5[%c0_1, %c0_2] : memref<8x32xf32, #tpu.memory_space<vmem>>, vector<8x32xf32>
    %cst = arith.constant dense<0.000000e+00> : vector<24x32xf32>
    %2 = tpu.matmul %0, %1, %cst {dimension_numbers = #tpu.dot_dimension_numbers<[1], [0], [0], [1], [0, 0, 1, 1], [], []>} : vector<24x8xf32>, vector<8x32xf32>, vector<24x32xf32> -> vector<24x32xf32>
    %c0_3 = arith.constant 0 : index
    %c0_4 = arith.constant 0 : index
    %3 = vector.load %arg6[%c0_3, %c0_4] : memref<1x32xf32, #tpu.memory_space<vmem>>, vector<1x32xf32>
    %4 = vector.broadcast %3 : vector<1x32xf32> to vector<24x32xf32>
    %5 = arith.addf %2, %4 : vector<24x32xf32>
    %6 = vector.extract_strided_slice %5 {offsets = [0, 0], sizes = [24, 16], strides = [1, 1]} : vector<24x32xf32> to vector<24x16xf32>
    %7 = vector.extract_strided_slice %5 {offsets = [0, 16], sizes = [24, 16], strides = [1, 1]} : vector<24x32xf32> to vector<24x16xf32>
    %c0_5 = arith.constant 0 : index
    %c0_6 = arith.constant 0 : index
    %8 = vector.load %arg2[%c0_5, %c0_6] : memref<24x24xf32, #tpu.memory_space<vmem>>, vector<24x24xf32>
    %c0_7 = arith.constant 0 : index
    %c0_8 = arith.constant 0 : index
    %c0_9 = arith.constant 0 : index
    %9 = vector.load %arg7[%c0_7, %c0_8, %c0_9] : memref<2x16x48xf32, #tpu.memory_space<vmem>>, vector<1x16x48xf32>
    %10 = vector.shape_cast %9 : vector<1x16x48xf32> to vector<16x48xf32>
    %cst_10 = arith.constant dense<0.000000e+00> : vector<24x48xf32>
    %11 = tpu.matmul %6, %10, %cst_10 {dimension_numbers = #tpu.dot_dimension_numbers<[1], [0], [0], [1], [0, 0, 1, 1], [], []>} : vector<24x16xf32>, vector<16x48xf32>, vector<24x48xf32> -> vector<24x48xf32>
    %c0_11 = arith.constant 0 : index
    %c0_12 = arith.constant 0 : index
    %c0_13 = arith.constant 0 : index
    %12 = vector.load %arg8[%c0_11, %c0_12, %c0_13] : memref<2x1x48xf32, #tpu.memory_space<vmem>>, vector<1x1x48xf32>
    %13 = vector.shape_cast %12 : vector<1x1x48xf32> to vector<1x48xf32>
    %14 = vector.broadcast %13 : vector<1x48xf32> to vector<24x48xf32>
    %15 = arith.addf %11, %14 : vector<24x48xf32>
    %16 = vector.extract_strided_slice %15 {offsets = [0, 0], sizes = [24, 8], strides = [1, 1]} : vector<24x48xf32> to vector<24x8xf32>
    %17 = vector.extract_strided_slice %15 {offsets = [0, 16], sizes = [24, 8], strides = [1, 1]} : vector<24x48xf32> to vector<24x8xf32>
    %18 = vector.extract_strided_slice %15 {offsets = [0, 32], sizes = [24, 8], strides = [1, 1]} : vector<24x48xf32> to vector<24x8xf32>
    %cst_14 = arith.constant dense<0.000000e+00> : vector<24x24xf32>
    %19 = tpu.matmul %16, %17, %cst_14 {dimension_numbers = #tpu.dot_dimension_numbers<[1], [1], [0], [0], [0, 0, 1, 0], [], []>} : vector<24x8xf32>, vector<24x8xf32>, vector<24x24xf32> -> vector<24x24xf32>
    %cst_15 = arith.constant 0.353553385 : f32
    %20 = vector.broadcast %cst_15 : f32 to vector<24x24xf32>
    %21 = arith.mulf %19, %20 : vector<24x24xf32>
    %22 = arith.addf %21, %8 : vector<24x24xf32>
    %cst_16 = arith.constant dense<0xFF800000> : vector<24xf32>
    %23 = vector.multi_reduction <maximumf>, %22, %cst_16 [1] : vector<24x24xf32> to vector<24xf32>
    %24 = vector.shape_cast %23 : vector<24xf32> to vector<24x1xf32>
    %25 = vector.broadcast %24 : vector<24x1xf32> to vector<24x24xf32>
    %26 = arith.subf %22, %25 : vector<24x24xf32>
    %27 = math.exp %26 : vector<24x24xf32>
    %cst_17 = arith.constant dense<0.000000e+00> : vector<24xf32>
    %28 = vector.multi_reduction <add>, %27, %cst_17 [1] : vector<24x24xf32> to vector<24xf32>
    %29 = vector.shape_cast %28 : vector<24xf32> to vector<24x1xf32>
    %30 = tpu.reciprocal %29 {approx = true} : vector<24x1xf32> -> vector<24x1xf32>
    %31 = vector.broadcast %30 : vector<24x1xf32> to vector<24x24xf32>
    %32 = arith.mulf %27, %31 : vector<24x24xf32>
    %cst_18 = arith.constant dense<0.000000e+00> : vector<24x8xf32>
    %33 = tpu.matmul %32, %18, %cst_18 {dimension_numbers = #tpu.dot_dimension_numbers<[1], [0], [0], [1], [0, 0, 1, 1], [], []>} : vector<24x24xf32>, vector<24x8xf32>, vector<24x8xf32> -> vector<24x8xf32>
    %34 = vector.extract_strided_slice %15 {offsets = [0, 8], sizes = [24, 8], strides = [1, 1]} : vector<24x48xf32> to vector<24x8xf32>
    %35 = vector.extract_strided_slice %15 {offsets = [0, 24], sizes = [24, 8], strides = [1, 1]} : vector<24x48xf32> to vector<24x8xf32>
    %36 = vector.extract_strided_slice %15 {offsets = [0, 40], sizes = [24, 8], strides = [1, 1]} : vector<24x48xf32> to vector<24x8xf32>
    %cst_19 = arith.constant dense<0.000000e+00> : vector<24x24xf32>
    %37 = tpu.matmul %34, %35, %cst_19 {dimension_numbers = #tpu.dot_dimension_numbers<[1], [1], [0], [0], [0, 0, 1, 0], [], []>} : vector<24x8xf32>, vector<24x8xf32>, vector<24x24xf32> -> vector<24x24xf32>
    %cst_20 = arith.constant 0.353553385 : f32
    %38 = vector.broadcast %cst_20 : f32 to vector<24x24xf32>
    %39 = arith.mulf %37, %38 : vector<24x24xf32>
    %40 = arith.addf %39, %8 : vector<24x24xf32>
    %cst_21 = arith.constant dense<0xFF800000> : vector<24xf32>
    %41 = vector.multi_reduction <maximumf>, %40, %cst_21 [1] : vector<24x24xf32> to vector<24xf32>
    %42 = vector.shape_cast %41 : vector<24xf32> to vector<24x1xf32>
    %43 = vector.broadcast %42 : vector<24x1xf32> to vector<24x24xf32>
    %44 = arith.subf %40, %43 : vector<24x24xf32>
    %45 = math.exp %44 : vector<24x24xf32>
    %cst_22 = arith.constant dense<0.000000e+00> : vector<24xf32>
    %46 = vector.multi_reduction <add>, %45, %cst_22 [1] : vector<24x24xf32> to vector<24xf32>
    %47 = vector.shape_cast %46 : vector<24xf32> to vector<24x1xf32>
    %48 = tpu.reciprocal %47 {approx = true} : vector<24x1xf32> -> vector<24x1xf32>
    %49 = vector.broadcast %48 : vector<24x1xf32> to vector<24x24xf32>
    %50 = arith.mulf %45, %49 : vector<24x24xf32>
    %cst_23 = arith.constant dense<0.000000e+00> : vector<24x8xf32>
    %51 = tpu.matmul %50, %36, %cst_23 {dimension_numbers = #tpu.dot_dimension_numbers<[1], [0], [0], [1], [0, 0, 1, 1], [], []>} : vector<24x24xf32>, vector<24x8xf32>, vector<24x8xf32> -> vector<24x8xf32>
    %52 = tpu.concatenate %33, %51 in 1 : vector<24x8xf32>, vector<24x8xf32> -> vector<24x16xf32>
    %c0_24 = arith.constant 0 : index
    %c0_25 = arith.constant 0 : index
    %c0_26 = arith.constant 0 : index
    %53 = vector.load %arg9[%c0_24, %c0_25, %c0_26] : memref<2x16x16xf32, #tpu.memory_space<vmem>>, vector<1x16x16xf32>
    %54 = vector.shape_cast %53 : vector<1x16x16xf32> to vector<16x16xf32>
    %cst_27 = arith.constant dense<0.000000e+00> : vector<24x16xf32>
    %55 = tpu.matmul %52, %54, %cst_27 {dimension_numbers = #tpu.dot_dimension_numbers<[1], [0], [0], [1], [0, 0, 1, 1], [], []>} : vector<24x16xf32>, vector<16x16xf32>, vector<24x16xf32> -> vector<24x16xf32>
    %c0_28 = arith.constant 0 : index
    %c0_29 = arith.constant 0 : index
    %c0_30 = arith.constant 0 : index
    %56 = vector.load %arg10[%c0_28, %c0_29, %c0_30] : memref<2x1x16xf32, #tpu.memory_space<vmem>>, vector<1x1x16xf32>
    %57 = vector.shape_cast %56 : vector<1x1x16xf32> to vector<1x16xf32>
    %58 = vector.broadcast %57 : vector<1x16xf32> to vector<24x16xf32>
    %59 = arith.addf %55, %58 : vector<24x16xf32>
    %c1 = arith.constant 1 : index
    %c0_31 = arith.constant 0 : index
    %c0_32 = arith.constant 0 : index
    %60 = vector.load %arg7[%c1, %c0_31, %c0_32] : memref<2x16x48xf32, #tpu.memory_space<vmem>>, vector<1x16x48xf32>
    %61 = vector.shape_cast %60 : vector<1x16x48xf32> to vector<16x48xf32>
    %cst_33 = arith.constant dense<0.000000e+00> : vector<24x48xf32>
    %62 = tpu.matmul %59, %61, %cst_33 {dimension_numbers = #tpu.dot_dimension_numbers<[1], [0], [0], [1], [0, 0, 1, 1], [], []>} : vector<24x16xf32>, vector<16x48xf32>, vector<24x48xf32> -> vector<24x48xf32>
    %c1_34 = arith.constant 1 : index
    %c0_35 = arith.constant 0 : index
    %c0_36 = arith.constant 0 : index
    %63 = vector.load %arg8[%c1_34, %c0_35, %c0_36] : memref<2x1x48xf32, #tpu.memory_space<vmem>>, vector<1x1x48xf32>
    %64 = vector.shape_cast %63 : vector<1x1x48xf32> to vector<1x48xf32>
    %65 = vector.broadcast %64 : vector<1x48xf32> to vector<24x48xf32>
    %66 = arith.addf %62, %65 : vector<24x48xf32>
    %67 = vector.extract_strided_slice %66 {offsets = [0, 0], sizes = [24, 8], strides = [1, 1]} : vector<24x48xf32> to vector<24x8xf32>
    %68 = vector.extract_strided_slice %66 {offsets = [0, 16], sizes = [24, 8], strides = [1, 1]} : vector<24x48xf32> to vector<24x8xf32>
    %69 = vector.extract_strided_slice %66 {offsets = [0, 32], sizes = [24, 8], strides = [1, 1]} : vector<24x48xf32> to vector<24x8xf32>
    %cst_37 = arith.constant dense<0.000000e+00> : vector<24x24xf32>
    %70 = tpu.matmul %67, %68, %cst_37 {dimension_numbers = #tpu.dot_dimension_numbers<[1], [1], [0], [0], [0, 0, 1, 0], [], []>} : vector<24x8xf32>, vector<24x8xf32>, vector<24x24xf32> -> vector<24x24xf32>
    %cst_38 = arith.constant 0.353553385 : f32
    %71 = vector.broadcast %cst_38 : f32 to vector<24x24xf32>
    %72 = arith.mulf %70, %71 : vector<24x24xf32>
    %73 = arith.addf %72, %8 : vector<24x24xf32>
    %cst_39 = arith.constant dense<0xFF800000> : vector<24xf32>
    %74 = vector.multi_reduction <maximumf>, %73, %cst_39 [1] : vector<24x24xf32> to vector<24xf32>
    %75 = vector.shape_cast %74 : vector<24xf32> to vector<24x1xf32>
    %76 = vector.broadcast %75 : vector<24x1xf32> to vector<24x24xf32>
    %77 = arith.subf %73, %76 : vector<24x24xf32>
    %78 = math.exp %77 : vector<24x24xf32>
    %cst_40 = arith.constant dense<0.000000e+00> : vector<24xf32>
    %79 = vector.multi_reduction <add>, %78, %cst_40 [1] : vector<24x24xf32> to vector<24xf32>
    %80 = vector.shape_cast %79 : vector<24xf32> to vector<24x1xf32>
    %81 = tpu.reciprocal %80 {approx = true} : vector<24x1xf32> -> vector<24x1xf32>
    %82 = vector.broadcast %81 : vector<24x1xf32> to vector<24x24xf32>
    %83 = arith.mulf %78, %82 : vector<24x24xf32>
    %cst_41 = arith.constant dense<0.000000e+00> : vector<24x8xf32>
    %84 = tpu.matmul %83, %69, %cst_41 {dimension_numbers = #tpu.dot_dimension_numbers<[1], [0], [0], [1], [0, 0, 1, 1], [], []>} : vector<24x24xf32>, vector<24x8xf32>, vector<24x8xf32> -> vector<24x8xf32>
    %85 = vector.extract_strided_slice %66 {offsets = [0, 8], sizes = [24, 8], strides = [1, 1]} : vector<24x48xf32> to vector<24x8xf32>
    %86 = vector.extract_strided_slice %66 {offsets = [0, 24], sizes = [24, 8], strides = [1, 1]} : vector<24x48xf32> to vector<24x8xf32>
    %87 = vector.extract_strided_slice %66 {offsets = [0, 40], sizes = [24, 8], strides = [1, 1]} : vector<24x48xf32> to vector<24x8xf32>
    %cst_42 = arith.constant dense<0.000000e+00> : vector<24x24xf32>
    %88 = tpu.matmul %85, %86, %cst_42 {dimension_numbers = #tpu.dot_dimension_numbers<[1], [1], [0], [0], [0, 0, 1, 0], [], []>} : vector<24x8xf32>, vector<24x8xf32>, vector<24x24xf32> -> vector<24x24xf32>
    %cst_43 = arith.constant 0.353553385 : f32
    %89 = vector.broadcast %cst_43 : f32 to vector<24x24xf32>
    %90 = arith.mulf %88, %89 : vector<24x24xf32>
    %91 = arith.addf %90, %8 : vector<24x24xf32>
    %cst_44 = arith.constant dense<0xFF800000> : vector<24xf32>
    %92 = vector.multi_reduction <maximumf>, %91, %cst_44 [1] : vector<24x24xf32> to vector<24xf32>
    %93 = vector.shape_cast %92 : vector<24xf32> to vector<24x1xf32>
    %94 = vector.broadcast %93 : vector<24x1xf32> to vector<24x24xf32>
    %95 = arith.subf %91, %94 : vector<24x24xf32>
    %96 = math.exp %95 : vector<24x24xf32>
    %cst_45 = arith.constant dense<0.000000e+00> : vector<24xf32>
    %97 = vector.multi_reduction <add>, %96, %cst_45 [1] : vector<24x24xf32> to vector<24xf32>
    %98 = vector.shape_cast %97 : vector<24xf32> to vector<24x1xf32>
    %99 = tpu.reciprocal %98 {approx = true} : vector<24x1xf32> -> vector<24x1xf32>
    %100 = vector.broadcast %99 : vector<24x1xf32> to vector<24x24xf32>
    %101 = arith.mulf %96, %100 : vector<24x24xf32>
    %cst_46 = arith.constant dense<0.000000e+00> : vector<24x8xf32>
    %102 = tpu.matmul %101, %87, %cst_46 {dimension_numbers = #tpu.dot_dimension_numbers<[1], [0], [0], [1], [0, 0, 1, 1], [], []>} : vector<24x24xf32>, vector<24x8xf32>, vector<24x8xf32> -> vector<24x8xf32>
    %103 = tpu.concatenate %84, %102 in 1 : vector<24x8xf32>, vector<24x8xf32> -> vector<24x16xf32>
    %c1_47 = arith.constant 1 : index
    %c0_48 = arith.constant 0 : index
    %c0_49 = arith.constant 0 : index
    %104 = vector.load %arg9[%c1_47, %c0_48, %c0_49] : memref<2x16x16xf32, #tpu.memory_space<vmem>>, vector<1x16x16xf32>
    %105 = vector.shape_cast %104 : vector<1x16x16xf32> to vector<16x16xf32>
    %cst_50 = arith.constant dense<0.000000e+00> : vector<24x16xf32>
    %106 = tpu.matmul %103, %105, %cst_50 {dimension_numbers = #tpu.dot_dimension_numbers<[1], [0], [0], [1], [0, 0, 1, 1], [], []>} : vector<24x16xf32>, vector<16x16xf32>, vector<24x16xf32> -> vector<24x16xf32>
    %c1_51 = arith.constant 1 : index
    %c0_52 = arith.constant 0 : index
    %c0_53 = arith.constant 0 : index
    %107 = vector.load %arg10[%c1_51, %c0_52, %c0_53] : memref<2x1x16xf32, #tpu.memory_space<vmem>>, vector<1x1x16xf32>
    %108 = vector.shape_cast %107 : vector<1x1x16xf32> to vector<1x16xf32>
    %109 = vector.broadcast %108 : vector<1x16xf32> to vector<24x16xf32>
    %110 = arith.addf %106, %109 : vector<24x16xf32>
    %111 = arith.addf %110, %7 : vector<24x16xf32>
    %cst_54 = arith.constant 0.000000e+00 : f32
    %112 = vector.broadcast %cst_54 : f32 to vector<24x16xf32>
    %113 = arith.maximumf %111, %112 : vector<24x16xf32>
    %cst_55 = arith.constant 0.000000e+00 : f32
    %114 = vector.broadcast %cst_55 : f32 to vector<24x128xf32>
    %c0_56 = arith.constant 0 : index
    %c0_57 = arith.constant 0 : index
    %115 = vector.load %arg3[%c0_56, %c0_57] : memref<24x6xf32, #tpu.memory_space<vmem>>, vector<24x1xf32>
    %116 = vector.broadcast %115 : vector<24x1xf32> to vector<24x16xf32>
    %117 = arith.mulf %113, %116 : vector<24x16xf32>
    %c0_58 = arith.constant 0 : index
    %c0_59 = arith.constant 0 : index
    %c0_60 = arith.constant 0 : index
    %118 = vector.load %arg11[%c0_58, %c0_59, %c0_60] : memref<6x16x128xf32, #tpu.memory_space<vmem>>, vector<1x16x128xf32>
    %119 = vector.shape_cast %118 : vector<1x16x128xf32> to vector<16x128xf32>
    %cst_61 = arith.constant dense<0.000000e+00> : vector<24x128xf32>
    %120 = tpu.matmul %117, %119, %cst_61 {dimension_numbers = #tpu.dot_dimension_numbers<[1], [0], [0], [1], [0, 0, 1, 1], [], []>} : vector<24x16xf32>, vector<16x128xf32>, vector<24x128xf32> -> vector<24x128xf32>
    %121 = arith.addf %114, %120 : vector<24x128xf32>
    %c0_62 = arith.constant 0 : index
    %c1_63 = arith.constant 1 : index
    %122 = vector.load %arg3[%c0_62, %c1_63] : memref<24x6xf32, #tpu.memory_space<vmem>>, vector<24x1xf32>
    %123 = vector.broadcast %122 : vector<24x1xf32> to vector<24x16xf32>
    %124 = arith.mulf %113, %123 : vector<24x16xf32>
    %c1_64 = arith.constant 1 : index
    %c0_65 = arith.constant 0 : index
    %c0_66 = arith.constant 0 : index
    %125 = vector.load %arg11[%c1_64, %c0_65, %c0_66] : memref<6x16x128xf32, #tpu.memory_space<vmem>>, vector<1x16x128xf32>
    %126 = vector.shape_cast %125 : vector<1x16x128xf32> to vector<16x128xf32>
    %cst_67 = arith.constant dense<0.000000e+00> : vector<24x128xf32>
    %127 = tpu.matmul %124, %126, %cst_67 {dimension_numbers = #tpu.dot_dimension_numbers<[1], [0], [0], [1], [0, 0, 1, 1], [], []>} : vector<24x16xf32>, vector<16x128xf32>, vector<24x128xf32> -> vector<24x128xf32>
    %128 = arith.addf %121, %127 : vector<24x128xf32>
    %c0_68 = arith.constant 0 : index
    %c2 = arith.constant 2 : index
    %129 = vector.load %arg3[%c0_68, %c2] : memref<24x6xf32, #tpu.memory_space<vmem>>, vector<24x1xf32>
    %130 = vector.broadcast %129 : vector<24x1xf32> to vector<24x16xf32>
    %131 = arith.mulf %113, %130 : vector<24x16xf32>
    %c2_69 = arith.constant 2 : index
    %c0_70 = arith.constant 0 : index
    %c0_71 = arith.constant 0 : index
    %132 = vector.load %arg11[%c2_69, %c0_70, %c0_71] : memref<6x16x128xf32, #tpu.memory_space<vmem>>, vector<1x16x128xf32>
    %133 = vector.shape_cast %132 : vector<1x16x128xf32> to vector<16x128xf32>
    %cst_72 = arith.constant dense<0.000000e+00> : vector<24x128xf32>
    %134 = tpu.matmul %131, %133, %cst_72 {dimension_numbers = #tpu.dot_dimension_numbers<[1], [0], [0], [1], [0, 0, 1, 1], [], []>} : vector<24x16xf32>, vector<16x128xf32>, vector<24x128xf32> -> vector<24x128xf32>
    %135 = arith.addf %128, %134 : vector<24x128xf32>
    %c0_73 = arith.constant 0 : index
    %c3 = arith.constant 3 : index
    %136 = vector.load %arg3[%c0_73, %c3] : memref<24x6xf32, #tpu.memory_space<vmem>>, vector<24x1xf32>
    %137 = vector.broadcast %136 : vector<24x1xf32> to vector<24x16xf32>
    %138 = arith.mulf %113, %137 : vector<24x16xf32>
    %c3_74 = arith.constant 3 : index
    %c0_75 = arith.constant 0 : index
    %c0_76 = arith.constant 0 : index
    %139 = vector.load %arg11[%c3_74, %c0_75, %c0_76] : memref<6x16x128xf32, #tpu.memory_space<vmem>>, vector<1x16x128xf32>
    %140 = vector.shape_cast %139 : vector<1x16x128xf32> to vector<16x128xf32>
    %cst_77 = arith.constant dense<0.000000e+00> : vector<24x128xf32>
    %141 = tpu.matmul %138, %140, %cst_77 {dimension_numbers = #tpu.dot_dimension_numbers<[1], [0], [0], [1], [0, 0, 1, 1], [], []>} : vector<24x16xf32>, vector<16x128xf32>, vector<24x128xf32> -> vector<24x128xf32>
    %142 = arith.addf %135, %141 : vector<24x128xf32>
    %c0_78 = arith.constant 0 : index
    %c4 = arith.constant 4 : index
    %143 = vector.load %arg3[%c0_78, %c4] : memref<24x6xf32, #tpu.memory_space<vmem>>, vector<24x1xf32>
    %144 = vector.broadcast %143 : vector<24x1xf32> to vector<24x16xf32>
    %145 = arith.mulf %113, %144 : vector<24x16xf32>
    %c4_79 = arith.constant 4 : index
    %c0_80 = arith.constant 0 : index
    %c0_81 = arith.constant 0 : index
    %146 = vector.load %arg11[%c4_79, %c0_80, %c0_81] : memref<6x16x128xf32, #tpu.memory_space<vmem>>, vector<1x16x128xf32>
    %147 = vector.shape_cast %146 : vector<1x16x128xf32> to vector<16x128xf32>
    %cst_82 = arith.constant dense<0.000000e+00> : vector<24x128xf32>
    %148 = tpu.matmul %145, %147, %cst_82 {dimension_numbers = #tpu.dot_dimension_numbers<[1], [0], [0], [1], [0, 0, 1, 1], [], []>} : vector<24x16xf32>, vector<16x128xf32>, vector<24x128xf32> -> vector<24x128xf32>
    %149 = arith.addf %142, %148 : vector<24x128xf32>
    %c0_83 = arith.constant 0 : index
    %c5 = arith.constant 5 : index
    %150 = vector.load %arg3[%c0_83, %c5] : memref<24x6xf32, #tpu.memory_space<vmem>>, vector<24x1xf32>
    %151 = vector.broadcast %150 : vector<24x1xf32> to vector<24x16xf32>
    %152 = arith.mulf %113, %151 : vector<24x16xf32>
    %c5_84 = arith.constant 5 : index
    %c0_85 = arith.constant 0 : index
    %c0_86 = arith.constant 0 : index
    %153 = vector.load %arg11[%c5_84, %c0_85, %c0_86] : memref<6x16x128xf32, #tpu.memory_space<vmem>>, vector<1x16x128xf32>
    %154 = vector.shape_cast %153 : vector<1x16x128xf32> to vector<16x128xf32>
    %cst_87 = arith.constant dense<0.000000e+00> : vector<24x128xf32>
    %155 = tpu.matmul %152, %154, %cst_87 {dimension_numbers = #tpu.dot_dimension_numbers<[1], [0], [0], [1], [0, 0, 1, 1], [], []>} : vector<24x16xf32>, vector<16x128xf32>, vector<24x128xf32> -> vector<24x128xf32>
    %156 = arith.addf %149, %155 : vector<24x128xf32>
    %c0_88 = arith.constant 0 : index
    %c0_89 = arith.constant 0 : index
    %157 = vector.load %arg4[%c0_88, %c0_89] : memref<4x24xf32, #tpu.memory_space<vmem>>, vector<4x24xf32>
    %cst_90 = arith.constant dense<0.000000e+00> : vector<4x128xf32>
    %158 = tpu.matmul %157, %156, %cst_90 {dimension_numbers = #tpu.dot_dimension_numbers<[1], [0], [0], [1], [0, 0, 1, 1], [], []>} : vector<4x24xf32>, vector<24x128xf32>, vector<4x128xf32> -> vector<4x128xf32>
    %c0_91 = arith.constant 0 : index
    %c0_92 = arith.constant 0 : index
    %159 = vector.load %arg12[%c0_91, %c0_92] : memref<1x128xf32, #tpu.memory_space<vmem>>, vector<1x128xf32>
    %160 = vector.broadcast %159 : vector<1x128xf32> to vector<4x128xf32>
    %161 = arith.addf %158, %160 : vector<4x128xf32>
    %c0_93 = arith.constant 0 : index
    %c0_94 = arith.constant 0 : index
    %162 = vector.load %arg13[%c0_93, %c0_94] : memref<4x128xf32, #tpu.memory_space<vmem>>, vector<4x128xf32>
    tpu.vector_store %arg13[%c0_93, %c0_94], %161 {strides = array<i32>} : memref<4x128xf32, #tpu.memory_space<vmem>>, vector<4x128xf32>,
    return
  }
  func.func @transform_0(%arg0: i32) -> (i32, i32) {
    %c0_i32 = arith.constant 0 : i32
    %c0_i32_0 = arith.constant 0 : i32
    return %arg0, %c0_i32 : i32, i32
  }
  func.func @transform_1(%arg0: i32) -> (i32, i32) {
    %c0_i32 = arith.constant 0 : i32
    %c0_i32_0 = arith.constant 0 : i32
    %c0_i32_1 = arith.constant 0 : i32
    return %c0_i32, %c0_i32_0 : i32, i32
  }
  func.func @transform_2(%arg0: i32) -> (i32, i32) {
    %c0_i32 = arith.constant 0 : i32
    %c0_i32_0 = arith.constant 0 : i32
    %c0_i32_1 = arith.constant 0 : i32
    return %c0_i32, %c0_i32_0 : i32, i32
  }
  func.func @transform_3(%arg0: i32) -> (i32, i32) {
    %c0_i32 = arith.constant 0 : i32
    %c0_i32_0 = arith.constant 0 : i32
    %c0_i32_1 = arith.constant 0 : i32
    return %c0_i32, %c0_i32_0 : i32, i32
  }
  func.func @transform_4(%arg0: i32) -> (i32, i32) {
    %c0_i32 = arith.constant 0 : i32
    %c0_i32_0 = arith.constant 0 : i32
    %c0_i32_1 = arith.constant 0 : i32
    return %c0_i32, %c0_i32_0 : i32, i32
  }
  func.func @transform_5(%arg0: i32) -> (i32, i32) {
    %c0_i32 = arith.constant 0 : i32
    %c0_i32_0 = arith.constant 0 : i32
    %c0_i32_1 = arith.constant 0 : i32
    return %c0_i32, %c0_i32_0 : i32, i32
  }
  func.func @transform_6(%arg0: i32) -> (i32, i32, i32) {
    %c0_i32 = arith.constant 0 : i32
    %c0_i32_0 = arith.constant 0 : i32
    %c0_i32_1 = arith.constant 0 : i32
    %c0_i32_2 = arith.constant 0 : i32
    return %c0_i32, %c0_i32_0, %c0_i32_1 : i32, i32, i32
  }
  func.func @transform_7(%arg0: i32) -> (i32, i32, i32) {
    %c0_i32 = arith.constant 0 : i32
    %c0_i32_0 = arith.constant 0 : i32
    %c0_i32_1 = arith.constant 0 : i32
    %c0_i32_2 = arith.constant 0 : i32
    return %c0_i32, %c0_i32_0, %c0_i32_1 : i32, i32, i32
  }
  func.func @transform_8(%arg0: i32) -> (i32, i32, i32) {
    %c0_i32 = arith.constant 0 : i32
    %c0_i32_0 = arith.constant 0 : i32
    %c0_i32_1 = arith.constant 0 : i32
    %c0_i32_2 = arith.constant 0 : i32
    return %c0_i32, %c0_i32_0, %c0_i32_1 : i32, i32, i32
  }
  func.func @transform_9(%arg0: i32) -> (i32, i32, i32) {
    %c0_i32 = arith.constant 0 : i32
    %c0_i32_0 = arith.constant 0 : i32
    %c0_i32_1 = arith.constant 0 : i32
    %c0_i32_2 = arith.constant 0 : i32
    return %c0_i32, %c0_i32_0, %c0_i32_1 : i32, i32, i32
  }
  func.func @transform_10(%arg0: i32) -> (i32, i32, i32) {
    %c0_i32 = arith.constant 0 : i32
    %c0_i32_0 = arith.constant 0 : i32
    %c0_i32_1 = arith.constant 0 : i32
    %c0_i32_2 = arith.constant 0 : i32
    return %c0_i32, %c0_i32_0, %c0_i32_1 : i32, i32, i32
  }
  func.func @transform_11(%arg0: i32) -> (i32, i32) {
    %c0_i32 = arith.constant 0 : i32
    %c0_i32_0 = arith.constant 0 : i32
    %c0_i32_1 = arith.constant 0 : i32
    return %c0_i32, %c0_i32_0 : i32, i32
  }
  func.func @transform_12(%arg0: i32) -> (i32, i32) {
    %c0_i32 = arith.constant 0 : i32
    %c0_i32_0 = arith.constant 0 : i32
    return %arg0, %c0_i32 : i32, i32
  }
}

</mosaic_0001>

<bundles_post_ra>
// kernel: tpu_custom_call.1
= control target key start
LH: loop header
LB: loop body
LE: loop exit
PB: predicated region body
PF: predicated region fallthrough
CT: control target
= control target key end

     0   :  { %17 = vsyncpa [#allocation3], 0  ;;  %s1983_s0 = inlined_call_operand.vmem [shape: f32[24,8], index: 0, kind: input, shape index: {}]   ;;  %s1984_s1 = inlined_call_operand.vmem [shape: f32[24,24], index: 1, kind: input, shape index: {}]   ;;  %s1985_s2 = inlined_call_operand.vmem [shape: f32[24,6], index: 2, kind: input, shape index: {}]   ;;  %s1986_s3 = inlined_call_operand.hbm [shape: f32[4,24], index: 3, kind: input, shape index: {}]   ;;  %s1987_s4 = inlined_call_operand.hbm [shape: f32[8,32], index: 4, kind: input, shape index: {}]   ;;  %s1988_s5 = inlined_call_operand.hbm [shape: f32[1,32], index: 5, kind: input, shape index: {}]   ;;  %s1989_s6 = inlined_call_operand.vmem [shape: f32[2,16,48], index: 6, kind: input, shape index: {}]   ;;  %s1990_s7 = inlined_call_operand.vmem [shape: f32[2,1,48], index: 7, kind: input, shape index: {}]   ;;  %s1991_s8 = inlined_call_operand.hbm [shape: f32[2,16,16], index: 8, kind: input, shape index: {}]   ;;  %s1992_s9 = inlined_call_operand.vmem [shape: f32[2,1,16], index: 9, kind: input, shape index: {}]   ;;  %s1993_s10 = inlined_call_operand.hbm [shape: f32[6,16,128], index: 10, kind: input, shape index: {}]   ;;  %s1994_s11 = inlined_call_operand.vmem [shape: f32[1,128], index: 11, kind: input, shape index: {}]   ;;  %s1995_s12 = inlined_call_operand.hbm [shape: f32[4,128], index: 12, kind: output, shape index: {}]  }
   0x1   :  { %18 = vsyncpa [#allocation6], 0 }
   0x2   :  { %19 = vsyncpa [#allocation9], 0  ;;  %s43_s23 = sshll.u32 %s1987_s4, 4  ;;  %s44_s23 = int_to_ptr.hbm [resolvable:$true] %s43_s23 }
   0x3   :  { %20 = vsyncpa [#allocation4], 0  ;;  %s1619_s24 = smov [#allocation5]   ;;  %s68_s28 = sshll.u32 %s1991_s8, 4  ;;  %s69_s28 = int_to_ptr.hbm [resolvable:$true] %s68_s28 }
   0x4   :  { %s45_s25 = sshll.u32 %s1619_s24, 4  ;;  %s1620_s29 = smov [#allocation8]   ;;  %s46_s25 = int_to_ptr.vmem [resolvable:$true] %s45_s25 }
   0x5   :  { %48 = dma.hbm_to_vmem [thread:$0]  %s44_s23, 128, %s46_s25, [#allocation6]  }
   0x6   :  { %s70_s30 = sshll.u32 %s1620_s29, 4  ;;  %s1621_s13 = smov 128   ;;  %s71_s30 = int_to_ptr.vmem [resolvable:$true] %s70_s30 }
   0x7   :  { %s1622_s14 = smov 8   ;;  %s32_s16 = sshll.u32 %s1986_s3, 4  ;;  %s33_s16 = int_to_ptr.hbm [resolvable:$true] %s32_s16 }
   0x8   :  { %76 = dma.hbm_to_vmem [thread:$0]  %s69_s28, 512, %s71_s30, [#allocation9], %s1621_s13, %s1621_s13, %s1622_s14  }
   0x9   :  { %s1623_s17 = smov [#allocation2]   ;;  %s54_s8 = sshll.u32 %s1988_s5, 4  ;;  %s55_s8 = int_to_ptr.hbm [resolvable:$true] %s54_s8 }
   0xa   :  { %s34_s18 = sshll.u32 %s1623_s17, 4  ;;  %s1624_s21 = smov [#allocation7]   ;;  %s35_s18 = int_to_ptr.vmem [resolvable:$true] %s34_s18 }
   0xb   :  { %37 = dma.hbm_to_vmem [thread:$0]  %s33_s16, 64, %s35_s18, [#allocation3]  }
   0xc   :  { %s56_s22 = sshll.u32 %s1624_s21, 4  ;;  %s83_s25 = sshll.u32 %s1993_s10, 4  ;;  %s57_s22 = int_to_ptr.vmem [resolvable:$true] %s56_s22  ;;  %s84_s25 = int_to_ptr.hbm [resolvable:$true] %s83_s25 }
   0xd   :  { %59 = dma.hbm_to_vmem [thread:$0]  %s55_s8, 16, %s57_s22, [#allocation6]  }
   0xe   :  { %s1625_s3 = smov [#allocation10]  }
   0xf   :  { %s85_s26 = sshll.u32 %s1625_s3, 4  ;;  %s86_s26 = int_to_ptr.vmem [resolvable:$true] %s85_s26 }
  0x10   :  { %91 = dma.hbm_to_vmem [thread:$0]  %s84_s25, 1536, %s86_s26, [#allocation9], %s1621_s13, %s1621_s13, %s1622_s14  }
  0x11   :  { %1611 = dma.done.wait [#allocation3], 64  }
  0x12   :  { %1612 = vsyncadd [#allocation3], 4294967232 }
  0x13   :  { %1613 = dma.done.wait [#allocation6], 144  }
  0x14   :  { %1614 = vsyncadd [#allocation6], 4294967152 }
  0x15   :  { %1615 = dma.done.wait [#allocation9], 2048  }
  0x16   :  { %1616 = vsyncadd [#allocation9], 4294965248  ;;  %vm122_vm0 = vcmask 64512   ;;  %v117_v0 = vld [vmem:[#allocation5] sm:$0xff]  ;;  %v116_v3 = vld [vmem:[%s1983_s0 + $0x10] sm:$0xff]  ;;  %vm167_vm1 = vcmask 130048  }
  0x17   :  { %v114_v1 = vld [vmem:[%s1983_s0] sm:$0xff]  ;;  %147 = vmatpush.msra.mxu0 %v117_v0  ;;  %v115_v2 = vld [vmem:[%s1983_s0 + $0x8] sm:$0xff]  ;;  %s1626_s18 = smov 104   ;;  %s1627_s19 = smov 120   ;;  %vm256_vm2 = vcmask 195584   ;;  %v1813_v48 = vld [vmem:[%s1984_s1 + $0x10] sm:$0xff] }
  0x18   :  { %1285 = vmatmul.msk.f32.vlgmr.msra.gmra.mxu0 %vm122_vm0, %v114_v1  ;;  %v162_v4 = vld [vmem:[%s1989_s6 + $0x8] sm:$0xff]  ;;  %v161_v5 = vld [vmem:[%s1989_s6] sm:$0xff]  ;;  %s1628_s20 = smov 112   ;;  %s1629_s3 = smov 88  }
  0x19   :  { %191 = vmatpush.msra.mxu1 %v162_v4  ;;  %v1413_v6 = vld [vmem:[#allocation7] ss:$0 sm:$0xff]  ;;  %v1414_v13 = vld [vmem:[%s1990_s7] ss:$0 sm:$0xff]  ;;  %s1273_s21 = sshll.u32 %s1995_s12, 4  ;;  %s1274_s21 = int_to_ptr.hbm [resolvable:$true] %s1273_s21 }
  0x1a   :  { %v1795_v30 = vld [vmem:[%s1984_s1] sm:$0xff]  ;;  %v1804_v39 = vld [vmem:[%s1984_s1 + $0x8] sm:$0xff]  ;;  %s1630_s1 = smov 96  }
  0x1b   :  { %192 = vmatpush.msra.mxu1 %v161_v5 }
  0x20   :  { %1286 = vmatmul.msk.f32.gmra.mxu0 %vm122_vm0, %v115_v2 }
  0x28   :  { %1287 = vmatmul.msk.f32.gmra.mxu0 %vm122_vm0, %v116_v3 }
  0x95   :  { %v149_v7 = vpop.f32.mrf.mxu0 }
  0x96   :  { %v1738_v8 = vadd.f32 %v1413_v6, %v149_v7 }
  0x98   :  { %1288 = vmatmul.msk.f32.vlgmr.msra.gmra.mxu1 %vm167_vm1, %v1738_v8 }
  0x9d   :  { %v152_v9 = vpop.f32.mrf.mxu0 }
  0x9e   :  { %v1742_v10 = vadd.f32 %v1413_v6, %v152_v9 }
  0xa0   :  { %1289 = vmatmul.msk.f32.gmra.mxu1 %vm167_vm1, %v1742_v10 }
  0xa5   :  { %v155_v11 = vpop.f32.mrf.mxu0 }
  0xa6   :  { %v1746_v12 = vadd.f32 %v1413_v6, %v155_v11 }
  0xa8   :  { %1290 = vmatmul.msk.f32.gmra.mxu1 %vm167_vm1, %v1746_v12 }
 0x115   :  { %v194_v14 = vpop.f32.mrf.mxu1 }
 0x116   :  { %v1753_v15 = vadd.f32 %v1414_v13, %v194_v14 }
 0x118   :  { %340 = vrot.lane.b32.xlu1 %v1753_v15, %s1626_s18 }
 0x11d   :  { %v197_v16 = vpop.f32.mrf.mxu1 }
 0x11e   :  { %v1757_v17 = vadd.f32 %v1414_v13, %v197_v16 }
 0x120   :  { %336 = vrot.lane.b32.xlu2 %v1757_v17, %s1627_s19  ;;  %334 = vrot.lane.b32.xlu1 %v1753_v15, %s1627_s19 }
 0x125   :  { %v200_v18 = vpop.f32.mrf.mxu1 }
 0x126   :  { %v1763_v19 = vadd.f32 %v1414_v13, %v200_v18 }
 0x128   :  { %344 = vrot.lane.b32.xlu0 %v1763_v19, %s1626_s18  ;;  %210 = vrot.lane.b32.xlu2 %v1763_v19, %s1628_s20  ;;  %v1380_v56 = vpack.i.bf16 %v1757_v17, %v1763_v19 }
 0x129   :  { %208 = vrot.lane.b32.xlu1 %v1757_v17, %s1628_s20 }
 0x130   :  { %342 = vrot.lane.b32.xlu0 %v1757_v17, %s1626_s18  ;;  %206 = vrot.lane.b32.xlu2 %v1753_v15, %s1628_s20 }
 0x138   :  { %338 = vrot.lane.b32.xlu0 %v1763_v19, %s1627_s19 }
 0x17a   :  { %v337_v20 = vpop.permute.xlu2 %336 }
 0x182   :  { %v211_v21 = vpop.permute.xlu2 %210 }
 0x183   :  { %1291 = vmatpush.xpose.msk.msra.mxu2 %vm122_vm0, %v211_v21 }
 0x18a   :  { %v341_v22 = vpop.permute.xlu1 %340  ;;  %v207_v26 = vpop.permute.xlu2 %206 }
 0x192   :  { %v335_v23 = vpop.permute.xlu1 %334 }
 0x19a   :  { %v345_v24 = vpop.permute.xlu0 %344 }
 0x19b   :  { %v209_v25 = vpop.permute.xlu1 %208  ;;  %1300 = vmatpush.xpose.msk.msrb.mxu0 %vm122_vm0, %v345_v24 }
 0x19c   :  { %1292 = vmatpush.xpose.msk.msra.mxu2 %vm122_vm0, %v209_v25 }
 0x1a0   :  { %1293 = vmatpush.xpose.msk.msra.mxu2 %vm122_vm0, %v207_v26 }
 0x1a2   :  { %v343_v27 = vpop.permute.xlu0 %342 }
 0x1a3   :  { %1294 = vmatmul.msk.f32.vlgmr.msra.gmra.mxu2 %vm122_vm0, %v1753_v15  ;;  %1301 = vmatpush.xpose.msk.msrb.mxu0 %vm122_vm0, %v343_v27 }
 0x1a7   :  { %1302 = vmatpush.xpose.msk.msrb.mxu0 %vm122_vm0, %v341_v22 }
 0x1aa   :  { %1303 = vmatmul.msk.f32.vlgmr.msrb.gmra.mxu0 %vm122_vm0, %v335_v23  ;;  %v339_v28 = vpop.permute.xlu0 %338 }
 0x1ab   :  { %1295 = vmatmul.msk.f32.gmra.mxu2 %vm122_vm0, %v1757_v17 }
 0x1b2   :  { %1304 = vmatmul.msk.f32.gmra.mxu0 %vm122_vm0, %v337_v20 }
 0x1b3   :  { %1296 = vmatmul.msk.f32.gmra.mxu2 %vm122_vm0, %v1763_v19 }
 0x1ba   :  { %1305 = vmatmul.msk.f32.gmra.mxu0 %vm122_vm0, %v339_v28 }
 0x226   :  { %v241_v29 = vpop.f32.mrf.mxu2 }
 0x227   :  { %v250_v31 = vmul.f32 0.35355338, %v241_v29  ;;  %v375_v32 = vpop.f32.mrf.mxu0 }
 0x228   :  { %v384_v33 = vmul.f32 0.35355338, %v375_v32 }
 0x229   :  { %v253_v34 = vadd.f32 %v250_v31, %v1795_v30 }
 0x22a   :  { %v387_v35 = vadd.f32 %v384_v33, %v1795_v30 }
 0x22b   :  { %v257_v36 = vsel %vm256_vm2, %v253_v34, -inf }
 0x22c   :  { %258 = vmax.xlane.f32.xlu2 %v257_v36  ;;  %v390_v37 = vsel %vm256_vm2, %v387_v35, -inf }
 0x22d   :  { %391 = vmax.xlane.f32.xlu0 %v390_v37 }
 0x22e   :  { %v244_v38 = vpop.f32.mrf.mxu2 }
 0x22f   :  { %v251_v40 = vmul.f32 0.35355338, %v244_v38  ;;  %v378_v41 = vpop.f32.mrf.mxu0 }
 0x230   :  { %v385_v42 = vmul.f32 0.35355338, %v378_v41 }
 0x231   :  { %v254_v43 = vadd.f32 %v251_v40, %v1804_v39 }
 0x232   :  { %v388_v44 = vadd.f32 %v385_v42, %v1804_v39 }
 0x233   :  { %v260_v46 = vsel %vm256_vm2, %v254_v43, -inf }
 0x234   :  { %v393_v45 = vsel %vm256_vm2, %v388_v44, -inf }
 0x235   :  { %394 = vmax.xlane.f32.xlu1 %v393_v45  ;;  %261 = vmax.xlane.f32.xlu0 %v260_v46 }
 0x236   :  { %v247_v47 = vpop.f32.mrf.mxu2 }
 0x237   :  { %v252_v49 = vmul.f32 0.35355338, %v247_v47  ;;  %v381_v50 = vpop.f32.mrf.mxu0 }
 0x238   :  { %v386_v51 = vmul.f32 0.35355338, %v381_v50 }
 0x239   :  { %v255_v52 = vadd.f32 %v252_v49, %v1813_v48 }
 0x23a   :  { %v389_v53 = vadd.f32 %v386_v51, %v1813_v48 }
 0x23b   :  { %v263_v55 = vsel %vm256_vm2, %v255_v52, -inf }
 0x23c   :  { %v396_v54 = vsel %vm256_vm2, %v389_v53, -inf }
 0x23d   :  { %397 = vmax.xlane.f32.xlu2 %v396_v54  ;;  %264 = vmax.xlane.f32.xlu1 %v263_v55 }
 0x249   :  { %1381 = vrot.lane.b32.xlu0 %v1380_v56, %s1629_s3 }
 0x251   :  { %1386 = vrot.lane.b32.xlu0 %v1380_v56, %s1630_s1 }
 0x259   :  { %290 = vrot.lane.b32.xlu0 %v1753_v15, %s1630_s1 }
 0x29f   :  { %v259_v60 = vpop.xlane.xlu2 %258 }
 0x2a0   :  { %v392_v57 = vpop.xlane.xlu0 %391  ;;  %v266_v7 = vsub.f32 %v253_v34, %v259_v60 }
 0x2a1   :  { %v399_v58 = vsub.f32 %v387_v35, %v392_v57 }
 0x2a2   :  { %v269_v11 = vmul.f32 1.442695, %v266_v7  ;;  %v1415_v7 = vld [vmem:[%s1992_s9] ss:$0 sm:$0xff] }
 0x2a3   :  { %v402_v59 = vmul.f32 1.442695, %v399_v58  ;;  %v483_v58 = vld [vmem:[#allocation8 + $0x8] sm:$0xff] }
 0x2a4   :  { %511 = vmatpush.msrb.mxu2 %v483_v58 }
 0x2a5   :  { %1419 = vpow2.f32 %v402_v59  ;;  %v482_v59 = vld [vmem:[#allocation8] sm:$0xff] }
 0x2a6   :  { %512 = vmatpush.msrb.mxu2 %v482_v59 }
 0x2a8   :  { %v395_v61 = vpop.xlane.xlu1 %394  ;;  %v262_v4 = vpop.xlane.xlu0 %261 }
 0x2a9   :  { %v400_v62 = vsub.f32 %v388_v44, %v395_v61  ;;  %v267_v16 = vsub.f32 %v254_v43, %v262_v4 }
 0x2ab   :  { %v1420_v63 = vpop.eup %1419  ;;  %v404_v0 = vmul.f32 1.442695, %v400_v62  ;;  %v271_v20 = vmul.f32 1.442695, %v267_v16 }
 0x2ac   :  { %v408_v1 = vsel %vm256_vm2, %v1420_v63, 0.0 }
 0x2ad   :  { %409 = vadd.xlane.f32.xlu2 %v408_v1  ;;  %1421 = vpow2.f32 %v404_v0 }
 0x2b0   :  { %v398_v2 = vpop.xlane.xlu2 %397  ;;  %v265_v29 = vpop.xlane.xlu1 %264 }
 0x2b1   :  { %v401_v3 = vsub.f32 %v389_v53, %v398_v2  ;;  %v268_v31 = vsub.f32 %v255_v52, %v265_v29 }
 0x2b3   :  { %v406_v5 = vmul.f32 1.442695, %v401_v3  ;;  %v1422_v6 = vpop.eup %1421  ;;  %v273_v32 = vmul.f32 1.442695, %v268_v31 }
 0x2b4   :  { %v411_v9 = vsel %vm256_vm2, %v1422_v6, 0.0 }
 0x2b5   :  { %1423 = vpow2.f32 %v406_v5  ;;  %412 = vadd.xlane.f32.xlu1 %v411_v9  ;;  %v1313_v5 = vld [vmem:[%s1989_s6 + $0x18] sm:$0xff] }
 0x2b6   :  { %1425 = vpow2.f32 %v269_v11  ;;  %554 = vmatpush.msra.mxu2 %v1313_v5 }
 0x2b7   :  { %1427 = vpow2.f32 %v271_v20 }
 0x2b8   :  { %1429 = vpow2.f32 %v273_v32 }
 0x2bb   :  { %v1424_v13 = vpop.eup %1423  ;;  %v1382_v14 = vpop.permute.xlu0 %1381 }
 0x2bc   :  { %v414_v17 = vsel %vm256_vm2, %v1424_v13, 0.0  ;;  %v1383_v18 = vunpack.i.l.bf16 %v1382_v14  ;;  %v1384_v19 = vunpack.i.h.bf16 %v1382_v14  ;;  %v1426_v21 = vpop.eup %1425 }
 0x2bd   :  { %415 = vadd.xlane.f32.xlu1 %v414_v17  ;;  %v275_v24 = vsel %vm256_vm2, %v1426_v21, 0.0  ;;  %v1428_v26 = vpop.eup %1427 }
 0x2be   :  { %454 = vmatpush.msrb.mxu1 %v1383_v18  ;;  %v278_v28 = vsel %vm256_vm2, %v1428_v26, 0.0  ;;  %v1430_v33 = vpop.eup %1429 }
 0x2bf   :  { %v281_v34 = vsel %vm256_vm2, %v1430_v33, 0.0 }
 0x2c0   :  { %455 = vmatpush.msrb.mxu1 %v1384_v19  ;;  %v1416_v19 = vld [vmem:[%s1990_s7 + $0x1] ss:$0 sm:$0xff] }
 0x2c3   :  { %v1387_v22 = vpop.permute.xlu0 %1386 }
 0x2c4   :  { %v1388_v23 = vunpack.i.l.bf16 %v1387_v22  ;;  %v1389_v25 = vunpack.i.h.bf16 %v1387_v22 }
 0x2c5   :  { %423 = vrot.lane.b32.xlu2 %v1753_v15, %s1629_s3  ;;  %276 = vadd.xlane.f32.xlu1 %v275_v24 }
 0x2c6   :  { %321 = vmatpush.msra.mxu3 %v1388_v23 }
 0x2c8   :  { %322 = vmatpush.msra.mxu3 %v1389_v25 }
 0x2cb   :  { %v291_v27 = vpop.permute.xlu0 %290 }
 0x2cc   :  { %323 = vmatpush.msra.mxu3 %v291_v27 }
 0x2cd   :  { %279 = vadd.xlane.f32.xlu1 %v278_v28 }
 0x2ce   :  { %1359 = vmatpush.msrb.mxu3 %v483_v58 }
 0x2d0   :  { %1360 = vmatpush.msrb.mxu3 %v482_v59 }
 0x2ee   :  { %282 = vadd.xlane.f32.xlu2 %v281_v34 }
 0x320   :  { %v410_v15 = vpop.xlane.xlu2 %409 }
 0x321   :  { %1431 = vrcp.f32 %v410_v15 }
 0x327   :  { %v1432_v35 = vpop.eup %1431 }
 0x328   :  { %v424_v36 = vpop.permute.xlu2 %423  ;;  %v420_v37 = vmul.f32 %v1432_v35, %v1420_v63  ;;  %v413_v38 = vpop.xlane.xlu1 %412 }
 0x329   :  { %456 = vmatpush.msrb.mxu1 %v424_v36  ;;  %1433 = vrcp.f32 %v413_v38 }
 0x32a   :  { %1306 = vmatmul.msk.f32.vlgmr.msrb.gmra.mxu1 %vm256_vm2, %v420_v37 }
 0x32f   :  { %v1434_v40 = vpop.eup %1433 }
 0x330   :  { %v416_v41 = vpop.xlane.xlu1 %415  ;;  %v421_v42 = vmul.f32 %v1434_v40, %v1422_v6  ;;  %v1312_v6 = vld [vmem:[%s1989_s6 + $0x10] sm:$0xff] }
 0x331   :  { %1435 = vrcp.f32 %v416_v41  ;;  %555 = vmatpush.msra.mxu2 %v1312_v6 }
 0x332   :  { %1307 = vmatmul.msk.f32.gmra.mxu1 %vm256_vm2, %v421_v42 }
 0x337   :  { %v1436_v43 = vpop.eup %1435 }
 0x338   :  { %v277_v44 = vpop.xlane.xlu1 %276  ;;  %v422_v45 = vmul.f32 %v1436_v43, %v1424_v13 }
 0x339   :  { %1437 = vrcp.f32 %v277_v44 }
 0x33a   :  { %1308 = vmatmul.msk.f32.gmra.mxu1 %vm256_vm2, %v422_v45 }
 0x33f   :  { %v1438_v46 = vpop.eup %1437 }
 0x340   :  { %v280_v47 = vpop.xlane.xlu1 %279  ;;  %v287_v49 = vmul.f32 %v1438_v46, %v1426_v21 }
 0x341   :  { %1439 = vrcp.f32 %v280_v47 }
 0x342   :  { %1297 = vmatmul.msk.f32.vlgmr.msra.gmra.mxu3 %vm256_vm2, %v287_v49 }
 0x347   :  { %v1440_v50 = vpop.eup %1439 }
 0x348   :  { %v288_v51 = vmul.f32 %v1440_v50, %v1428_v26 }
 0x34a   :  { %1298 = vmatmul.msk.f32.gmra.mxu3 %vm256_vm2, %v288_v51 }
 0x361   :  { %v283_v52 = vpop.xlane.xlu2 %282 }
 0x362   :  { %1441 = vrcp.f32 %v283_v52 }
 0x368   :  { %v1442_v53 = vpop.eup %1441 }
 0x369   :  { %v289_v54 = vmul.f32 %v1442_v53, %v1430_v33 }
 0x36b   :  { %1299 = vmatmul.msk.f32.gmra.mxu3 %vm256_vm2, %v289_v54 }
 0x3a7   :  { %v458_v55 = vpop.f32.mrf.mxu1 }
 0x3a8   :  { %470 = vrot.lane.b32.xlu1 %v458_v55, %s1622_s14 }
 0x3af   :  { %v461_v56 = vpop.f32.mrf.mxu1 }
 0x3b0   :  { %472 = vrot.lane.b32.xlu0 %v461_v56, %s1622_s14 }
 0x3b7   :  { %v464_v57 = vpop.f32.mrf.mxu1 }
 0x3b8   :  { %474 = vrot.lane.b32.xlu0 %v464_v57, %s1622_s14 }
 0x3c5   :  { %v325_v60 = vpop.f32.mrf.mxu3 }
 0x3cd   :  { %v328_v63 = vpop.f32.mrf.mxu3 }
 0x3ee   :  { %v331_v2 = vpop.f32.mrf.mxu3 }
 0x41a   :  { %v471_v61 = vpop.permute.xlu1 %470 }
 0x41b   :  { %v479_v62 = vsel %vm122_vm0, %v325_v60, %v471_v61 }
 0x41c   :  { %1309 = vmatmul.msk.f32.vlgmr.msrb.gmra.mxu2 %vm167_vm1, %v479_v62 }
 0x422   :  { %v473_v0 = vpop.permute.xlu0 %472 }
 0x423   :  { %v480_v1 = vsel %vm122_vm0, %v328_v63, %v473_v0 }
 0x424   :  { %1310 = vmatmul.msk.f32.vlgmr.msrb.gmra.mxu3 %vm167_vm1, %v480_v1 }
 0x42a   :  { %v475_v3 = vpop.permute.xlu0 %474 }
 0x42b   :  { %v481_v4 = vsel %vm122_vm0, %v331_v2, %v475_v3 }
 0x42c   :  { %1311 = vmatmul.msk.f32.gmra.mxu3 %vm167_vm1, %v481_v4 }
 0x49f   :  { %v514_v9 = vpop.f32.mrf.mxu2 }
 0x4a0   :  { %v515_v11 = vadd.f32 %v1415_v7, %v514_v9 }
 0x4a2   :  { %1315 = vmatmul.msk.f32.vlgmr.msra.gmra.mxu2 %vm167_vm1, %v515_v11 }
 0x4a7   :  { %v517_v13 = vpop.f32.mrf.mxu3 }
 0x4a8   :  { %v518_v14 = vadd.f32 %v1415_v7, %v517_v13 }
 0x4aa   :  { %1316 = vmatmul.msk.f32.gmra.mxu2 %vm167_vm1, %v518_v14 }
 0x4af   :  { %v520_v16 = vpop.f32.mrf.mxu3 }
 0x4b0   :  { %v521_v17 = vadd.f32 %v1415_v7, %v520_v16 }
 0x4b2   :  { %1317 = vmatmul.msk.f32.gmra.mxu2 %vm167_vm1, %v521_v17 }
 0x525   :  { %v557_v18 = vpop.f32.mrf.mxu2 }
 0x526   :  { %v1867_v24 = vadd.f32 %v1416_v19, %v557_v18 }
 0x52d   :  { %v560_v20 = vpop.f32.mrf.mxu2 }
 0x52e   :  { %v1863_v21 = vadd.f32 %v1416_v19, %v560_v20 }
 0x530   :  { %704 = vrot.lane.b32.xlu1 %v1863_v21, %s1626_s18 }
 0x535   :  { %v563_v22 = vpop.f32.mrf.mxu2 }
 0x536   :  { %v564_v23 = vadd.f32 %v1416_v19, %v563_v22 }
 0x538   :  { %700 = vrot.lane.b32.xlu2 %v564_v23, %s1627_s19  ;;  %706 = vrot.lane.b32.xlu0 %v564_v23, %s1626_s18  ;;  %v1390_v59 = vpack.i.bf16 %v1863_v21, %v564_v23 }
 0x539   :  { %696 = vrot.lane.b32.xlu1 %v1867_v24, %s1627_s19 }
 0x540   :  { %702 = vrot.lane.b32.xlu0 %v1867_v24, %s1626_s18  ;;  %s1637_s18 = smov [#allocation11]  }
 0x541   :  { %573 = vrot.lane.b32.xlu1 %v564_v23, %s1628_s20 }
 0x548   :  { %698 = vrot.lane.b32.xlu0 %v1863_v21, %s1627_s19  ;;  %s1271_s19 = sshll.u32 %s1637_s18, 4  ;;  %s1272_s19 = int_to_ptr.vmem [resolvable:$true] %s1271_s19 }
 0x549   :  { %569 = vrot.lane.b32.xlu1 %v1867_v24, %s1628_s20 }
 0x550   :  { %571 = vrot.lane.b32.xlu0 %v1863_v21, %s1628_s20 }
 0x592   :  { %v701_v33 = vpop.permute.xlu2 %700 }
 0x5a2   :  { %v705_v25 = vpop.permute.xlu1 %704 }
 0x5aa   :  { %v707_v26 = vpop.permute.xlu0 %706 }
 0x5ab   :  { %v697_v27 = vpop.permute.xlu1 %696  ;;  %1327 = vmatpush.xpose.msk.msra.mxu3 %vm122_vm0, %v707_v26 }
 0x5af   :  { %1328 = vmatpush.xpose.msk.msra.mxu3 %vm122_vm0, %v705_v25 }
 0x5b2   :  { %v703_v28 = vpop.permute.xlu0 %702 }
 0x5b3   :  { %v574_v29 = vpop.permute.xlu1 %573  ;;  %1329 = vmatpush.xpose.msk.msra.mxu3 %vm122_vm0, %v703_v28 }
 0x5b4   :  { %1318 = vmatpush.xpose.msk.msra.mxu0 %vm122_vm0, %v574_v29 }
 0x5b6   :  { %1330 = vmatmul.msk.f32.vlgmr.msra.gmra.mxu3 %vm122_vm0, %v697_v27 }
 0x5ba   :  { %v699_v31 = vpop.permute.xlu0 %698 }
 0x5bb   :  { %v570_v34 = vpop.permute.xlu1 %569 }
 0x5be   :  { %1331 = vmatmul.msk.f32.gmra.mxu3 %vm122_vm0, %v699_v31 }
 0x5c2   :  { %v572_v32 = vpop.permute.xlu0 %571 }
 0x5c3   :  { %1319 = vmatpush.xpose.msk.msra.mxu0 %vm122_vm0, %v572_v32 }
 0x5c6   :  { %1332 = vmatmul.msk.f32.gmra.mxu3 %vm122_vm0, %v701_v33 }
 0x5c7   :  { %1320 = vmatpush.xpose.msk.msra.mxu0 %vm122_vm0, %v570_v34 }
 0x5ca   :  { %1321 = vmatmul.msk.f32.vlgmr.msra.gmra.mxu0 %vm122_vm0, %v1867_v24 }
 0x5d2   :  { %1322 = vmatmul.msk.f32.gmra.mxu0 %vm122_vm0, %v1863_v21 }
 0x5da   :  { %1323 = vmatmul.msk.f32.gmra.mxu0 %vm122_vm0, %v564_v23 }
 0x639   :  { %v737_v15 = vpop.f32.mrf.mxu3 }
 0x63a   :  { %v746_v35 = vmul.f32 0.35355338, %v737_v15 }
 0x63c   :  { %v749_v36 = vadd.f32 %v746_v35, %v1795_v30 }
 0x63e   :  { %v752_v37 = vsel %vm256_vm2, %v749_v36, -inf }
 0x63f   :  { %753 = vmax.xlane.f32.xlu0 %v752_v37 }
 0x641   :  { %v740_v38 = vpop.f32.mrf.mxu3 }
 0x642   :  { %v747_v40 = vmul.f32 0.35355338, %v740_v38 }
 0x644   :  { %v750_v41 = vadd.f32 %v747_v40, %v1804_v39 }
 0x646   :  { %v755_v42 = vsel %vm256_vm2, %v750_v41, -inf }
 0x647   :  { %756 = vmax.xlane.f32.xlu1 %v755_v42  ;;  %v604_v43 = vpop.f32.mrf.mxu0 }
 0x648   :  { %v613_v44 = vmul.f32 0.35355338, %v604_v43 }
 0x649   :  { %v743_v45 = vpop.f32.mrf.mxu3 }
 0x64a   :  { %v748_v46 = vmul.f32 0.35355338, %v743_v45  ;;  %v616_v47 = vadd.f32 %v613_v44, %v1795_v30 }
 0x64c   :  { %v619_v49 = vsel %vm256_vm2, %v616_v47, -inf  ;;  %v751_v50 = vadd.f32 %v748_v46, %v1813_v48 }
 0x64d   :  { %620 = vmax.xlane.f32.xlu0 %v619_v49 }
 0x64e   :  { %v758_v51 = vsel %vm256_vm2, %v751_v50, -inf }
 0x64f   :  { %759 = vmax.xlane.f32.xlu2 %v758_v51  ;;  %v607_v52 = vpop.f32.mrf.mxu0 }
 0x650   :  { %v614_v53 = vmul.f32 0.35355338, %v607_v52 }
 0x652   :  { %v617_v54 = vadd.f32 %v614_v53, %v1804_v39 }
 0x654   :  { %v622_v55 = vsel %vm256_vm2, %v617_v54, -inf }
 0x655   :  { %623 = vmax.xlane.f32.xlu0 %v622_v55 }
 0x657   :  { %v610_v56 = vpop.f32.mrf.mxu0 }
 0x658   :  { %v615_v57 = vmul.f32 0.35355338, %v610_v56 }
 0x65a   :  { %v618_v58 = vadd.f32 %v615_v57, %v1813_v48  ;;  %v1631_v57 = vmov 0  }
 0x65b   :  { %1400 = vset.pattern.permute.xlu0 %v1631_v57 }
 0x65c   :  { %v625_v30 = vsel %vm256_vm2, %v618_v58, -inf }
 0x65d   :  { %626 = vmax.xlane.f32.xlu0 %v625_v30  ;;  %v902_v30 = vld [vmem:[%s1985_s2] sm:$0xff] }
 0x667   :  { %1391 = vrot.lane.b32.xlu2 %v1390_v59, %s1629_s3 }
 0x66f   :  { %1396 = vrot.lane.b32.xlu2 %v1390_v59, %s1630_s1  ;;  %v903_v59 = vld [vmem:[%s1985_s2 + $0x8] sm:$0xff] }
 0x677   :  { %652 = vrot.lane.b32.xlu2 %v1867_v24, %s1630_s1 }
 0x6b2   :  { %v754_v39 = vpop.xlane.xlu0 %753 }
 0x6b3   :  { %v761_v60 = vsub.f32 %v749_v36, %v754_v39  ;;  %v846_v39 = vld [vmem:[#allocation8 + $0x18] sm:$0xff] }
 0x6b4   :  { %875 = vmatpush.msrb.mxu0 %v846_v39 }
 0x6b5   :  { %v764_v61 = vmul.f32 1.442695, %v761_v60  ;;  %v1632_v60 = vmov 1  }
 0x6b6   :  { %1401 = vset.pattern.permute.xlu2 %v1632_v60 }
 0x6b7   :  { %1443 = vpow2.f32 %v764_v61  ;;  %v845_v61 = vld [vmem:[#allocation8 + $0x10] sm:$0xff] }
 0x6b8   :  { %876 = vmatpush.msrb.mxu0 %v845_v61 }
 0x6ba   :  { %v757_v62 = vpop.xlane.xlu1 %756 }
 0x6bb   :  { %v762_v63 = vsub.f32 %v750_v41, %v757_v62  ;;  %v1634_v62 = vmov 5  }
 0x6bd   :  { %v1444_v0 = vpop.eup %1443  ;;  %v766_v48 = vmul.f32 1.442695, %v762_v63  ;;  %v1635_v63 = vmov 4  }
 0x6be   :  { %v770_v1 = vsel %vm256_vm2, %v1444_v0, 0.0 }
 0x6bf   :  { %1445 = vpow2.f32 %v766_v48  ;;  %771 = vadd.xlane.f32.xlu1 %v770_v1 }
 0x6c0   :  { %v621_v2 = vpop.xlane.xlu0 %620 }
 0x6c1   :  { %v628_v6 = vsub.f32 %v616_v47, %v621_v2 }
 0x6c2   :  { %v760_v3 = vpop.xlane.xlu2 %759 }
 0x6c3   :  { %v763_v4 = vsub.f32 %v751_v50, %v760_v3  ;;  %v631_v11 = vmul.f32 1.442695, %v628_v6 }
 0x6c5   :  { %v1914_v5 = vpop.eup %1445  ;;  %v768_v7 = vmul.f32 1.442695, %v763_v4 }
 0x6c6   :  { %v773_v9 = vsel %vm256_vm2, %v1914_v5, 0.0 }
 0x6c7   :  { %1447 = vpow2.f32 %v768_v7  ;;  %774 = vadd.xlane.f32.xlu1 %v773_v9 }
 0x6c8   :  { %v624_v13 = vpop.xlane.xlu0 %623  ;;  %1449 = vpow2.f32 %v631_v11 }
 0x6c9   :  { %v629_v18 = vsub.f32 %v617_v54, %v624_v13 }
 0x6ca   :  { %v1392_v14 = vpop.permute.xlu2 %1391 }
 0x6cb   :  { %v1393_v16 = vunpack.i.l.bf16 %v1392_v14  ;;  %v1394_v19 = vunpack.i.h.bf16 %v1392_v14  ;;  %v633_v21 = vmul.f32 1.442695, %v629_v18  ;;  %v1030_v18 = vld [vmem:[#allocation10 + $0x28] sm:$0xff] }
 0x6cd   :  { %v1448_v17 = vpop.eup %1447  ;;  %816 = vmatpush.msrb.mxu2 %v1393_v16  ;;  %1451 = vpow2.f32 %v633_v21  ;;  %v924_v16 = vld [vmem:[#allocation10 + $0x8] sm:$0xff]  ;;  %v923_v21 = vld [vmem:[#allocation10] sm:$0xff] }
 0x6ce   :  { %v776_v20 = vsel %vm256_vm2, %v1448_v17, 0.0  ;;  %v1450_v23 = vpop.eup %1449  ;;  %1001 = vmatpush.msrb.mxu3 %v924_v16 }
 0x6cf   :  { %817 = vmatpush.msrb.mxu2 %v1394_v19  ;;  %777 = vadd.xlane.f32.xlu0 %v776_v20  ;;  %v637_v27 = vsel %vm256_vm2, %v1450_v23, 0.0  ;;  %v1086_v19 = vld [vmem:[#allocation10 + $0x38] sm:$0xff]  ;;  %v941_v20 = vld [vmem:[#allocation10 + $0x10] sm:$0xff] }
 0x6d0   :  { %v627_v32 = vpop.xlane.xlu0 %626  ;;  %1110 = vmatpush.msra.mxu0 %v1086_v19  ;;  %1002 = vmatpush.msrb.mxu3 %v923_v21 }
 0x6d1   :  { %v630_v33 = vsub.f32 %v618_v58, %v627_v32  ;;  %v1142_v32 = vld [vmem:[#allocation10 + $0x48] sm:$0xff] }
 0x6d2   :  { %v1397_v22 = vpop.permute.xlu2 %1396 }
 0x6d3   :  { %v1398_v25 = vunpack.i.l.bf16 %v1397_v22  ;;  %v1399_v26 = vunpack.i.h.bf16 %v1397_v22  ;;  %v1452_v29 = vpop.eup %1451  ;;  %v635_v34 = vmul.f32 1.442695, %v630_v33  ;;  %v1029_v22 = vld [vmem:[#allocation10 + $0x20] sm:$0xff] }
 0x6d4   :  { %v640_v31 = vsel %vm256_vm2, %v1452_v29, 0.0  ;;  %v1141_v33 = vld [vmem:[#allocation10 + $0x40] sm:$0xff] }
 0x6d5   :  { %683 = vmatpush.msra.mxu1 %v1398_v25  ;;  %1453 = vpow2.f32 %v635_v34  ;;  %v1085_v25 = vld [vmem:[#allocation10 + $0x30] sm:$0xff] }
 0x6d6   :  { %1111 = vmatpush.msra.mxu0 %v1085_v25  ;;  %v1197_v34 = vld [vmem:[#allocation10 + $0x50] sm:$0xff] }
 0x6d7   :  { %684 = vmatpush.msra.mxu1 %v1399_v26  ;;  %638 = vadd.xlane.f32.xlu0 %v637_v27 }
 0x6da   :  { %v653_v28 = vpop.permute.xlu2 %652 }
 0x6db   :  { %685 = vmatpush.msra.mxu1 %v653_v28  ;;  %v1454_v15 = vpop.eup %1453 }
 0x6dc   :  { %v643_v35 = vsel %vm256_vm2, %v1454_v15, 0.0 }
 0x6df   :  { %641 = vadd.xlane.f32.xlu0 %v640_v31  ;;  %v1198_v31 = vld [vmem:[#allocation10 + $0x58] sm:$0xff] }
 0x6e0   :  { %785 = vrot.lane.b32.xlu1 %v1867_v24, %s1629_s3  ;;  %1222 = vmatpush.msra.mxu3 %v1198_v31 }
 0x6e2   :  { %1223 = vmatpush.msra.mxu3 %v1197_v34 }
 0x70a   :  { %644 = vadd.xlane.f32.xlu1 %v643_v35  ;;  %v1417_v35 = vld [vmem:[%s1992_s9 + $0x1] ss:$0 sm:$0xff] }
 0x723   :  { %891 = vrot.lane.b32.xlu1 %v1746_v12, %s1628_s20 }
 0x732   :  { %v772_v36 = vpop.xlane.xlu1 %771 }
 0x733   :  { %1455 = vrcp.f32 %v772_v36 }
 0x739   :  { %v1456_v41 = vpop.eup %1455 }
 0x73a   :  { %v775_v38 = vpop.xlane.xlu1 %774  ;;  %v782_v24 = vmul.f32 %v1456_v41, %v1444_v0  ;;  %v1636_v0 = vmov 3  }
 0x742   :  { %v778_v37 = vpop.xlane.xlu0 %777 }
 0x74a   :  { %v639_v40 = vpop.xlane.xlu0 %638 }
 0x74b   :  { %1457 = vrcp.f32 %v639_v40 }
 0x74c   :  { %1459 = vrcp.f32 %v775_v38 }
 0x751   :  { %v1458_v42 = vpop.eup %1457 }
 0x752   :  { %v649_v43 = vmul.f32 %v1458_v42, %v1450_v23  ;;  %v786_v44 = vpop.permute.xlu1 %785  ;;  %v642_v45 = vpop.xlane.xlu0 %641 }
 0x753   :  { %1461 = vrcp.f32 %v642_v45  ;;  %818 = vmatpush.msrb.mxu2 %v786_v44  ;;  %v1460_v12 = vpop.eup %1459 }
 0x754   :  { %1324 = vmatmul.msk.f32.vlgmr.msra.gmra.mxu1 %vm256_vm2, %v649_v43  ;;  %1333 = vmatmul.msk.f32.vlgmr.msrb.gmra.mxu2 %vm256_vm2, %v782_v24  ;;  %1463 = vrcp.f32 %v778_v37  ;;  %v783_v49 = vmul.f32 %v1460_v12, %v1914_v5 }
 0x755   :  { %1054 = vmatpush.msra.mxu2 %v1030_v18 }
 0x757   :  { %1055 = vmatpush.msra.mxu2 %v1029_v22 }
 0x759   :  { %v1462_v46 = vpop.eup %1461 }
 0x75a   :  { %v650_v47 = vmul.f32 %v1462_v46, %v1452_v29  ;;  %v1464_v50 = vpop.eup %1463 }
 0x75b   :  { %v784_v51 = vmul.f32 %v1464_v50, %v1448_v17  ;;  %v942_v17 = vld [vmem:[#allocation10 + $0x18] sm:$0xff] }
 0x75c   :  { %1325 = vmatmul.msk.f32.gmra.mxu1 %vm256_vm2, %v650_v47  ;;  %1334 = vmatmul.msk.f32.gmra.mxu2 %vm256_vm2, %v783_v49 }
 0x75d   :  { %966 = vmatpush.msrb.mxu1 %v942_v17 }
 0x75f   :  { %967 = vmatpush.msrb.mxu1 %v941_v20 }
 0x761   :  { %1166 = vmatpush.msra.mxu1 %v1142_v32 }
 0x763   :  { %1167 = vmatpush.msra.mxu1 %v1141_v33 }
 0x764   :  { %1335 = vmatmul.msk.f32.gmra.mxu2 %vm256_vm2, %v784_v51 }
 0x77d   :  { %v645_v52 = vpop.xlane.xlu1 %644 }
 0x77e   :  { %1465 = vrcp.f32 %v645_v52 }
 0x784   :  { %v1466_v53 = vpop.eup %1465 }
 0x785   :  { %v651_v54 = vmul.f32 %v1466_v53, %v1454_v15 }
 0x787   :  { %1326 = vmatmul.msk.f32.gmra.mxu1 %vm256_vm2, %v651_v54 }
 0x795   :  { %v892_v26 = vpop.permute.xlu1 %891 }
 0x7d1   :  { %v687_v48 = vpop.f32.mrf.mxu1 }
 0x7d7   :  { %v820_v55 = vpop.f32.mrf.mxu2 }
 0x7d8   :  { %832 = vrot.lane.b32.xlu0 %v820_v55, %s1622_s14 }
 0x7d9   :  { %v690_v4 = vpop.f32.mrf.mxu1 }
 0x7df   :  { %v823_v56 = vpop.f32.mrf.mxu2 }
 0x7e0   :  { %834 = vrot.lane.b32.xlu2 %v823_v56, %s1622_s14  ;;  %907 = vperm.xlu0 %1400, %v902_v30  }
 0x7e7   :  { %v826_v58 = vpop.f32.mrf.mxu2 }
 0x7e8   :  { %836 = vrot.lane.b32.xlu2 %v826_v58, %s1622_s14  ;;  %912 = vperm.xlu0 %1400, %v903_v59  }
 0x7f0   :  { %887 = vrot.lane.b32.xlu2 %v1738_v8, %s1628_s20  ;;  %v904_v8 = vld [vmem:[%s1985_s2 + $0x10] sm:$0xff] }
 0x7f1   :  { %917 = vperm.xlu0 %1400, %v904_v8  }
 0x7f8   :  { %889 = vrot.lane.b32.xlu2 %v1742_v10, %s1628_s20  ;;  %v1633_v10 = vmov 2  }
 0x7f9   :  { %1405 = vset.pattern.permute.xlu1 %v1633_v10  ;;  %1403 = vset.pattern.permute.xlu0 %v1632_v60 }
 0x7fa   :  { %1018 = vperm.xlu1 %1405, %v903_v59   ;;  %934 = vperm.xlu0 %1403, %v904_v8  }
 0x800   :  { %926 = vperm.xlu2 %1401, %v902_v30  }
 0x802   :  { %1408 = vset.pattern.permute.xlu1 %v1634_v62  ;;  %1407 = vset.pattern.permute.xlu0 %v1635_v63 }
 0x803   :  { %1186 = vperm.xlu1 %1408, %v903_v59   ;;  %1126 = vperm.xlu0 %1407, %v902_v30  }
 0x804   :  { %v693_v7 = vpop.f32.mrf.mxu1 }
 0x808   :  { %930 = vperm.xlu2 %1401, %v903_v59  }
 0x80b   :  { %1410 = vset.pattern.permute.xlu1 %v1636_v0  ;;  %1412 = vset.pattern.permute.xlu0 %v1634_v62 }
 0x80c   :  { %1074 = vperm.xlu1 %1410, %v903_v59   ;;  %1190 = vperm.xlu0 %1412, %v904_v8  }
 0x810   :  { %1402 = vset.pattern.permute.xlu2 %v1633_v10 }
 0x811   :  { %1014 = vperm.xlu2 %1402, %v902_v30  }
 0x814   :  { %1078 = vperm.xlu1 %1410, %v904_v8  }
 0x819   :  { %1404 = vset.pattern.permute.xlu2 %v1634_v62 }
 0x81a   :  { %1182 = vperm.xlu2 %1404, %v902_v30  }
 0x822   :  { %1406 = vset.pattern.permute.xlu2 %v1636_v0 }
 0x823   :  { %1070 = vperm.xlu2 %1406, %v902_v30  }
 0x82b   :  { %1409 = vset.pattern.permute.xlu2 %v1633_v10 }
 0x82c   :  { %1022 = vperm.xlu2 %1409, %v904_v8  }
 0x834   :  { %1411 = vset.pattern.permute.xlu2 %v1635_v63 }
 0x835   :  { %1130 = vperm.xlu2 %1411, %v903_v59  }
 0x83a   :  { %v835_v3 = vpop.permute.xlu2 %834 }
 0x83b   :  { %v842_v5 = vsel %vm122_vm0, %v690_v4, %v835_v3 }
 0x83d   :  { %1134 = vperm.xlu2 %1411, %v904_v8  }
 0x842   :  { %v837_v6 = vpop.permute.xlu2 %836 }
 0x843   :  { %v843_v9 = vsel %vm122_vm0, %v693_v7, %v837_v6 }
 0x84a   :  { %v833_v1 = vpop.permute.xlu0 %832  ;;  %v888_v11 = vpop.permute.xlu2 %887 }
 0x84b   :  { %v841_v2 = vsel %vm122_vm0, %v687_v48, %v833_v1 }
 0x84c   :  { %1337 = vmatmul.msk.f32.vlgmr.msrb.gmra.mxu0 %vm167_vm1, %v841_v2 }
 0x852   :  { %v890_v13 = vpop.permute.xlu2 %889  ;;  %v908_v28 = vpop.permute.xlu0 %907 }
 0x854   :  { %1338 = vmatmul.msk.f32.gmra.mxu0 %vm167_vm1, %v842_v5 }
 0x85a   :  { %v927_v14 = vpop.permute.xlu2 %926  ;;  %v913_v36 = vpop.permute.xlu0 %912 }
 0x85c   :  { %1339 = vmatmul.msk.f32.gmra.mxu0 %vm167_vm1, %v843_v9 }
 0x862   :  { %v931_v23 = vpop.permute.xlu2 %930 }
 0x863   :  { %v918_v12 = vpop.permute.xlu0 %917 }
 0x86b   :  { %v1015_v27 = vpop.permute.xlu2 %1014 }
 0x86c   :  { %v1019_v29 = vpop.permute.xlu1 %1018  ;;  %v935_v30 = vpop.permute.xlu0 %934 }
 0x874   :  { %v1183_v15 = vpop.permute.xlu2 %1182 }
 0x875   :  { %v1187_v38 = vpop.permute.xlu1 %1186  ;;  %v1127_v0 = vpop.permute.xlu0 %1126 }
 0x87d   :  { %v1071_v24 = vpop.permute.xlu2 %1070 }
 0x87e   :  { %v1075_v50 = vpop.permute.xlu1 %1074  ;;  %v1191_v6 = vpop.permute.xlu0 %1190 }
 0x886   :  { %v1079_v39 = vpop.permute.xlu1 %1078  ;;  %v1023_v61 = vpop.permute.xlu2 %1022 }
 0x88f   :  { %v1131_v2 = vpop.permute.xlu2 %1130 }
 0x897   :  { %v1135_v5 = vpop.permute.xlu2 %1134 }
 0x8c9   :  { %v878_v37 = vpop.f32.mrf.mxu0 }
 0x8ca   :  { %v879_v40 = vadd.f32 %v1417_v35, %v878_v37 }
 0x8cc   :  { %v896_v41 = vadd.f32 %v888_v11, %v879_v40 }
 0x8ce   :  { %v899_v42 = vmax.f32 %v896_v41, 0.0 }
 0x8d0   :  { %v937_v43 = vmul.f32 %v927_v14, %v899_v42  ;;  %v920_v44 = vmul.f32 %v908_v28, %v899_v42  ;;  %v1025_v45 = vmul.f32 %v1015_v27, %v899_v42  ;;  %v1081_v47 = vmul.f32 %v1071_v24, %v899_v42 }
 0x8d1   :  { %v881_v46 = vpop.f32.mrf.mxu0  ;;  %v1137_v48 = vmul.f32 %v1127_v0, %v899_v42  ;;  %v1193_v1 = vmul.f32 %v1183_v15, %v899_v42 }
 0x8d2   :  { %v882_v49 = vadd.f32 %v1417_v35, %v881_v46  ;;  %1340 = vmatmul.msk.f32.vlgmr.msrb.gmra.mxu1 %vm167_vm1, %v937_v43  ;;  %1343 = vmatmul.msk.f32.vlgmr.msrb.gmra.mxu3 %vm167_vm1, %v920_v44  ;;  %v1237_v46 = vld [vmem:[#allocation2] sm:$0xf] }
 0x8d3   :  { %1346 = vmatmul.msk.f32.vlgmr.msra.gmra.mxu2 %vm167_vm1, %v1025_v45  ;;  %1349 = vmatmul.msk.f32.vlgmr.msra.gmra.mxu0 %vm167_vm1, %v1081_v47  ;;  %v1418_v47 = vld [vmem:[%s1994_s11] ss:$0 sm:$0xff] }
 0x8d4   :  { %v897_v51 = vadd.f32 %v890_v13, %v882_v49 }
 0x8d6   :  { %v900_v52 = vmax.f32 %v897_v51, 0.0 }
 0x8d8   :  { %v1082_v53 = vmul.f32 %v1075_v50, %v900_v52  ;;  %v938_v54 = vmul.f32 %v931_v23, %v900_v52  ;;  %v921_v55 = vmul.f32 %v913_v36, %v900_v52  ;;  %v1026_v57 = vmul.f32 %v1019_v29, %v900_v52 }
 0x8d9   :  { %v884_v56 = vpop.f32.mrf.mxu0  ;;  %v1138_v3 = vmul.f32 %v1131_v2, %v900_v52  ;;  %v1194_v4 = vmul.f32 %v1187_v38, %v900_v52 }
 0x8da   :  { %v885_v58 = vadd.f32 %v1417_v35, %v884_v56  ;;  %1341 = vmatmul.msk.f32.gmra.mxu1 %vm167_vm1, %v938_v54  ;;  %1344 = vmatmul.msk.f32.gmra.mxu3 %vm167_vm1, %v921_v55 }
 0x8db   :  { %1347 = vmatmul.msk.f32.gmra.mxu2 %vm167_vm1, %v1026_v57  ;;  %1350 = vmatmul.msk.f32.gmra.mxu0 %vm167_vm1, %v1082_v53 }
 0x8dc   :  { %v898_v59 = vadd.f32 %v892_v26, %v885_v58 }
 0x8de   :  { %v901_v60 = vmax.f32 %v898_v59, 0.0 }
 0x8e0   :  { %v1083_v8 = vmul.f32 %v1079_v39, %v901_v60  ;;  %v939_v10 = vmul.f32 %v935_v30, %v901_v60  ;;  %v922_v62 = vmul.f32 %v918_v12, %v901_v60  ;;  %v1027_v63 = vmul.f32 %v1023_v61, %v901_v60 }
 0x8e1   :  { %v1139_v7 = vmul.f32 %v1135_v5, %v901_v60  ;;  %v1195_v9 = vmul.f32 %v1191_v6, %v901_v60 }
 0x8e2   :  { %1342 = vmatmul.msk.f32.gmra.mxu1 %vm167_vm1, %v939_v10  ;;  %1345 = vmatmul.msk.f32.gmra.mxu3 %vm167_vm1, %v922_v62 }
 0x8e3   :  { %1348 = vmatmul.msk.f32.gmra.mxu2 %vm167_vm1, %v1027_v63  ;;  %1351 = vmatmul.msk.f32.gmra.mxu0 %vm167_vm1, %v1083_v8 }
 0x8ea   :  { %1352 = vmatmul.msk.f32.vlgmr.msra.gmra.mxu1 %vm167_vm1, %v1137_v48  ;;  %1355 = vmatmul.msk.f32.vlgmr.msra.gmra.mxu3 %vm167_vm1, %v1193_v1 }
 0x8f2   :  { %1353 = vmatmul.msk.f32.gmra.mxu1 %vm167_vm1, %v1138_v3  ;;  %1356 = vmatmul.msk.f32.gmra.mxu3 %vm167_vm1, %v1194_v4 }
 0x8fa   :  { %1354 = vmatmul.msk.f32.gmra.mxu1 %vm167_vm1, %v1139_v7  ;;  %1357 = vmatmul.msk.f32.gmra.mxu3 %vm167_vm1, %v1195_v9 }
 0x94f   :  { %v969_v11 = vpop.f32.mrf.mxu1 }
 0x950   :  { %v1113_v19 = vpop.f32.mrf.mxu0 }
 0x955   :  { %v1004_v13 = vpop.f32.mrf.mxu3 }
 0x956   :  { %v1057_v18 = vpop.f32.mrf.mxu2  ;;  %v1005_v32 = vadd.f32 %v1004_v13, %v969_v11 }
 0x957   :  { %v972_v14 = vpop.f32.mrf.mxu1 }
 0x958   :  { %v1116_v25 = vpop.f32.mrf.mxu0  ;;  %v1066_v36 = vadd.f32 %v1057_v18, %v1005_v32 }
 0x95a   :  { %v1122_v42 = vadd.f32 %v1113_v19, %v1066_v36 }
 0x95d   :  { %v1007_v16 = vpop.f32.mrf.mxu3 }
 0x95e   :  { %v1060_v22 = vpop.f32.mrf.mxu2  ;;  %v1008_v28 = vadd.f32 %v1007_v16, %v972_v14 }
 0x95f   :  { %v975_v17 = vpop.f32.mrf.mxu1 }
 0x960   :  { %v1067_v34 = vadd.f32 %v1060_v22, %v1008_v28  ;;  %v1119_v15 = vpop.f32.mrf.mxu0 }
 0x962   :  { %v1123_v38 = vadd.f32 %v1116_v25, %v1067_v34 }
 0x965   :  { %v1010_v20 = vpop.f32.mrf.mxu3 }
 0x966   :  { %v1011_v27 = vadd.f32 %v1010_v20, %v975_v17  ;;  %v1063_v29 = vpop.f32.mrf.mxu2 }
 0x967   :  { %v1169_v21 = vpop.f32.mrf.mxu1 }
 0x968   :  { %v1068_v33 = vadd.f32 %v1063_v29, %v1011_v27  ;;  %v1178_v44 = vadd.f32 %v1169_v21, %v1122_v42 }
 0x96a   :  { %v1124_v37 = vadd.f32 %v1119_v15, %v1068_v33 }
 0x96d   :  { %v1225_v23 = vpop.f32.mrf.mxu3 }
 0x96e   :  { %v1234_v12 = vadd.f32 %v1225_v23, %v1178_v44 }
 0x96f   :  { %v1172_v26 = vpop.f32.mrf.mxu1 }
 0x970   :  { %v1179_v24 = vadd.f32 %v1172_v26, %v1123_v38 }
 0x975   :  { %v1228_v31 = vpop.f32.mrf.mxu3 }
 0x976   :  { %v1235_v45 = vadd.f32 %v1228_v31, %v1179_v24 }
 0x977   :  { %v1175_v35 = vpop.f32.mrf.mxu1 }
 0x978   :  { %v1180_v40 = vadd.f32 %v1175_v35, %v1124_v37 }
 0x97d   :  { %v1231_v41 = vpop.f32.mrf.mxu3 }
 0x97e   :  { %v1236_v43 = vadd.f32 %v1231_v41, %v1180_v40 }
 0x980   :  { %1258 = vmatpush.msrb.mxu2 %v1236_v43 }
 0x982   :  { %1259 = vmatpush.msrb.mxu2 %v1235_v45 }
 0x984   :  { %1260 = vmatpush.msrb.mxu2 %v1234_v12 }
 0x985   :  { %1358 = vmatmul.msk.f32.vlgmr.msrb.gmra.mxu2 %vm256_vm2, %v1237_v46 }
 0xa08   :  { %v1262_v49 = vpop.f32.mrf.mxu2 }
 0xa09   :  { %v1263_v50 = vadd.f32 %v1418_v47, %v1262_v49 }
 0xa0b   :  { %1265 = vst [vmem:[#allocation11] sm:$0xf] %v1263_v50 }
 0xa0c   :  { %1276 = dma.vmem_to_hbm [thread:$0]  %s1272_s19, 64, %s1274_s21, [#allocation4]  }
 0xa0d   :  { %1617 = dma.done.wait [#allocation4], 64  }
 0xa0e   :  { %1618 = vsyncadd [#allocation4], 4294967232 }
 0xa0f   :  { %1281 = vsyncpa [#allocation3], 1 }
 0xa10   :  { %1282 = vsyncpa [#allocation6], 1 }
 0xa11   :  { %1283 = vsyncpa [#allocation9], 1 }
 0xa12   :  { %1284 = vsyncpa [#allocation4], 1 }

</bundles_post_ra>
